<compile_context>
chip_gen: v6e
topology: v6e:2x2x1
jax: 0.10.0
libtpu: 0.0.40
codegen_flags: <defaults>
</compile_context>

<pallas_src>
import jax
import jax.numpy as jnp
from jax.experimental import pallas as pl
from jax.experimental.pallas import tpu as pltpu

# Layer sizes as defined by the module's __init__.
DIMS = [3 * 32 * 32, 64, 128, 256, 128, 64, 10]
N_LAYERS = len(DIMS) - 1
LANE = 128


def _round_up(x, m):
    return (x + m - 1) // m * m


# Lane-padded layer widths: [3072, 128, 128, 256, 128, 128, 128]
PAD_DIMS = [DIMS[0]] + [_round_up(d, LANE) for d in DIMS[1:]]
OUT_PAD = PAD_DIMS[-1]


def mlp_kernel(x_ref,
               w1_ref, b1_ref,
               w2_ref, b2_ref,
               w3_ref, b3_ref,
               w4_ref, b4_ref,
               w5_ref, b5_ref,
               w6_ref, b6_ref,
               o_ref):
    """Fused 6x (Linear [+ ReLU]) on one batch tile. bf16 MXU, f32 accumulate."""
    w_refs = (w1_ref, w2_ref, w3_ref, w4_ref, w5_ref, w6_ref)
    b_refs = (b1_ref, b2_ref, b3_ref, b4_ref, b5_ref, b6_ref)

    # x arrives as f32 straight from HBM (single read); cast on-chip for the MXU.
    h = x_ref[...].astype(jnp.bfloat16)  # bf16 [TM, 3072]
    for i in range(N_LAYERS):
        acc = jnp.dot(h, w_refs[i][...],
                      preferred_element_type=jnp.float32) + b_refs[i][...]
        if i < N_LAYERS - 1:
            # ReLU / bias math in f32 (v5e-friendly), downcast for next MXU pass.
            h = jnp.maximum(acc, 0.0).astype(jnp.bfloat16)
        else:
            o_ref[...] = acc.astype(o_ref.dtype)


def init_params(key):
    """PyTorch-style init U(-1/sqrt(fan_in), 1/sqrt(fan_in)), zero-padded to
    lane-aligned shapes. Weights stored (in, out) in bf16; biases (1, out) f32."""
    params = []
    for i in range(N_LAYERS):
        fan_in, fan_out = DIMS[i], DIMS[i + 1]
        pin, pout = PAD_DIMS[i], PAD_DIMS[i + 1]
        key, kw, kb = jax.random.split(key, 3)
        bound = 1.0 / jnp.sqrt(jnp.float32(fan_in))
        w = jax.random.uniform(kw, (fan_in, fan_out), jnp.float32, -bound, bound)
        b = jax.random.uniform(kb, (fan_out,), jnp.float32, -bound, bound)
        w_pad = jnp.zeros((pin, pout), jnp.float32).at[:fan_in, :fan_out].set(w)
        b_pad = jnp.zeros((1, pout), jnp.float32).at[0, :fan_out].set(b)
        params.append((w_pad.astype(jnp.bfloat16), b_pad))
    return params


def simple_neural_network(x_nchw, params, *, tm=256):
    """Flatten (free reshape) + batch-tiled fused Pallas MLP kernel."""
    B = x_nchw.shape[0]
    # Reshape is metadata-only; keep f32 so the kernel reads HBM exactly once.
    x_flat = x_nchw.reshape(B, -1).astype(jnp.float32)  # [B, 3072]

    # Tile: multiple of 8 sublanes, clamped for tiny batches; pad B to a whole
    # number of tiles so every grid step is full.
    TM = min(tm, _round_up(B, 8))
    B_pad = _round_up(B, TM)
    if B_pad != B:
        x_flat = jnp.pad(x_flat, ((0, B_pad - B), (0, 0)))

    flat_params = []
    in_specs = [pl.BlockSpec((TM, DIMS[0]), lambda i: (i, 0))]
    for w, b in params:
        flat_params.extend([w, b])
        # Constant index_map: weights/biases fetched once, VMEM-resident.
        in_specs.append(pl.BlockSpec(w.shape, lambda i: (0, 0)))
        in_specs.append(pl.BlockSpec(b.shape, lambda i: (0, 0)))

    flops = 2 * B_pad * sum(PAD_DIMS[i] * PAD_DIMS[i + 1] for i in range(N_LAYERS))
    weight_bytes = sum(w.size * w.dtype.itemsize + b.size * b.dtype.itemsize
                       for w, b in params)
    bytes_accessed = B_pad * DIMS[0] * 4 + B_pad * OUT_PAD * 4 + weight_bytes

    out_pad = pl.pallas_call(
        mlp_kernel,
        out_shape=jax.ShapeDtypeStruct((B_pad, OUT_PAD), jnp.float32),
        grid=(B_pad // TM,),
        in_specs=in_specs,
        out_specs=pl.BlockSpec((TM, OUT_PAD), lambda i: (i, 0)),
        compiler_params=pltpu.CompilerParams(
            dimension_semantics=("parallel",)),
        cost_estimate=pl.CostEstimate(
            flops=flops, transcendentals=0, bytes_accessed=bytes_accessed),
    )(x_flat, *flat_params)

    # Strip batch padding and the zero-padded logit columns.
    return out_pad[:B, :DIMS[-1]]


def reference_forward(x_nchw, params):
    """Pure-JAX reference mirroring the kernel's bf16-MXU / f32-accumulate
    numerics (module semantics are identical up to the bf16 casts)."""
    h = x_nchw.reshape(x_nchw.shape[0], -1).astype(jnp.bfloat16)
    for i, (w, b) in enumerate(params):
        acc = jnp.dot(h, w, preferred_element_type=jnp.float32) + b
        if i < len(params) - 1:
            h = jnp.maximum(acc, 0.0).astype(jnp.bfloat16)
        else:
            h = acc
    return h[:, :DIMS[-1]]


if __name__ == "__main__":
    key = jax.random.PRNGKey(0)
    k_x, k_p = jax.random.split(key)

    # Small example input consistent with the module: NCHW [2, 3, 32, 32]
    x = jax.random.normal(k_x, (2, 3, 32, 32), jnp.float32)
    params = init_params(k_p)

    out = simple_neural_network(x, params)
    out = jax.block_until_ready(out)

    ref = reference_forward(x, params)
    assert out.shape == (2, 10)
    assert jnp.allclose(out, ref, atol=2e-2, rtol=2e-2), "mismatch vs reference"

    print("KERNEL_OK")
</pallas_src>

<mosaic_0001>
module attributes {stable_mosaic.version = 11 : i64} {
  func.func @mlp_kernel(%arg0: i32, %arg1: memref<8x3072xf32, #tpu.memory_space<vmem>>, %arg2: memref<3072x128xbf16, #tpu.memory_space<vmem>>, %arg3: memref<1x128xf32, #tpu.memory_space<vmem>>, %arg4: memref<128x128xbf16, #tpu.memory_space<vmem>>, %arg5: memref<1x128xf32, #tpu.memory_space<vmem>>, %arg6: memref<128x256xbf16, #tpu.memory_space<vmem>>, %arg7: memref<1x256xf32, #tpu.memory_space<vmem>>, %arg8: memref<256x128xbf16, #tpu.memory_space<vmem>>, %arg9: memref<1x128xf32, #tpu.memory_space<vmem>>, %arg10: memref<128x128xbf16, #tpu.memory_space<vmem>>, %arg11: memref<1x128xf32, #tpu.memory_space<vmem>>, %arg12: memref<128x128xbf16, #tpu.memory_space<vmem>>, %arg13: memref<1x128xf32, #tpu.memory_space<vmem>>, %arg14: memref<8x128xf32, #tpu.memory_space<vmem>>) attributes {dimension_semantics = [#tpu.dimension_semantics<parallel>], iteration_bounds = array<i64: 1>, scalar_prefetch = 0 : i64, scratch_operands = 0 : i64, tpu.core_type = #tpu.core_type<tc>, window_params = [{transform_indices = @transform_0, window_bounds = array<i64: 8, 3072>}, {pipeline_mode = #tpu.pipeline_mode<synchronous>, transform_indices = @transform_1, window_bounds = array<i64: 3072, 128>}, {pipeline_mode = #tpu.pipeline_mode<synchronous>, transform_indices = @transform_2, window_bounds = array<i64: 1, 128>}, {pipeline_mode = #tpu.pipeline_mode<synchronous>, transform_indices = @transform_3, window_bounds = array<i64: 128, 128>}, {pipeline_mode = #tpu.pipeline_mode<synchronous>, transform_indices = @transform_4, window_bounds = array<i64: 1, 128>}, {pipeline_mode = #tpu.pipeline_mode<synchronous>, transform_indices = @transform_5, window_bounds = array<i64: 128, 256>}, {pipeline_mode = #tpu.pipeline_mode<synchronous>, transform_indices = @transform_6, window_bounds = array<i64: 1, 256>}, {pipeline_mode = #tpu.pipeline_mode<synchronous>, transform_indices = @transform_7, window_bounds = array<i64: 256, 128>}, {pipeline_mode = #tpu.pipeline_mode<synchronous>, transform_indices = @transform_8, window_bounds = array<i64: 1, 128>}, {pipeline_mode = #tpu.pipeline_mode<synchronous>, transform_indices = @transform_9, window_bounds = array<i64: 128, 128>}, {pipeline_mode = #tpu.pipeline_mode<synchronous>, transform_indices = @transform_10, window_bounds = array<i64: 1, 128>}, {pipeline_mode = #tpu.pipeline_mode<synchronous>, transform_indices = @transform_11, window_bounds = array<i64: 128, 128>}, {pipeline_mode = #tpu.pipeline_mode<synchronous>, transform_indices = @transform_12, window_bounds = array<i64: 1, 128>}, {transform_indices = @transform_13, window_bounds = array<i64: 8, 128>}]} {
    %c0 = arith.constant 0 : index
    %c0_0 = arith.constant 0 : index
    %0 = vector.load %arg1[%c0, %c0_0] : memref<8x3072xf32, #tpu.memory_space<vmem>>, vector<8x3072xf32>
    %1 = arith.truncf %0 : vector<8x3072xf32> to vector<8x3072xbf16>
    %c0_1 = arith.constant 0 : index
    %c0_2 = arith.constant 0 : index
    %2 = vector.load %arg2[%c0_1, %c0_2] : memref<3072x128xbf16, #tpu.memory_space<vmem>>, vector<3072x128xbf16>
    %cst = arith.constant dense<0.000000e+00> : vector<8x128xf32>
    %3 = tpu.matmul %1, %2, %cst {dimension_numbers = #tpu.dot_dimension_numbers<[1], [0], [0], [1], [0, 0, 1, 1], [], []>} : vector<8x3072xbf16>, vector<3072x128xbf16>, vector<8x128xf32> -> vector<8x128xf32>
    %c0_3 = arith.constant 0 : index
    %c0_4 = arith.constant 0 : index
    %4 = vector.load %arg3[%c0_3, %c0_4] : memref<1x128xf32, #tpu.memory_space<vmem>>, vector<1x128xf32>
    %5 = vector.broadcast %4 : vector<1x128xf32> to vector<8x128xf32>
    %6 = arith.addf %3, %5 : vector<8x128xf32>
    %cst_5 = arith.constant 0.000000e+00 : f32
    %7 = vector.broadcast %cst_5 : f32 to vector<8x128xf32>
    %8 = arith.maximumf %6, %7 : vector<8x128xf32>
    %9 = arith.truncf %8 : vector<8x128xf32> to vector<8x128xbf16>
    %c0_6 = arith.constant 0 : index
    %c0_7 = arith.constant 0 : index
    %10 = vector.load %arg4[%c0_6, %c0_7] : memref<128x128xbf16, #tpu.memory_space<vmem>>, vector<128x128xbf16>
    %cst_8 = arith.constant dense<0.000000e+00> : vector<8x128xf32>
    %11 = tpu.matmul %9, %10, %cst_8 {dimension_numbers = #tpu.dot_dimension_numbers<[1], [0], [0], [1], [0, 0, 1, 1], [], []>} : vector<8x128xbf16>, vector<128x128xbf16>, vector<8x128xf32> -> vector<8x128xf32>
    %c0_9 = arith.constant 0 : index
    %c0_10 = arith.constant 0 : index
    %12 = vector.load %arg5[%c0_9, %c0_10] : memref<1x128xf32, #tpu.memory_space<vmem>>, vector<1x128xf32>
    %13 = vector.broadcast %12 : vector<1x128xf32> to vector<8x128xf32>
    %14 = arith.addf %11, %13 : vector<8x128xf32>
    %cst_11 = arith.constant 0.000000e+00 : f32
    %15 = vector.broadcast %cst_11 : f32 to vector<8x128xf32>
    %16 = arith.maximumf %14, %15 : vector<8x128xf32>
    %17 = arith.truncf %16 : vector<8x128xf32> to vector<8x128xbf16>
    %c0_12 = arith.constant 0 : index
    %c0_13 = arith.constant 0 : index
    %18 = vector.load %arg6[%c0_12, %c0_13] : memref<128x256xbf16, #tpu.memory_space<vmem>>, vector<128x256xbf16>
    %cst_14 = arith.constant dense<0.000000e+00> : vector<8x256xf32>
    %19 = tpu.matmul %17, %18, %cst_14 {dimension_numbers = #tpu.dot_dimension_numbers<[1], [0], [0], [1], [0, 0, 1, 1], [], []>} : vector<8x128xbf16>, vector<128x256xbf16>, vector<8x256xf32> -> vector<8x256xf32>
    %c0_15 = arith.constant 0 : index
    %c0_16 = arith.constant 0 : index
    %20 = vector.load %arg7[%c0_15, %c0_16] : memref<1x256xf32, #tpu.memory_space<vmem>>, vector<1x256xf32>
    %21 = vector.broadcast %20 : vector<1x256xf32> to vector<8x256xf32>
    %22 = arith.addf %19, %21 : vector<8x256xf32>
    %cst_17 = arith.constant 0.000000e+00 : f32
    %23 = vector.broadcast %cst_17 : f32 to vector<8x256xf32>
    %24 = arith.maximumf %22, %23 : vector<8x256xf32>
    %25 = arith.truncf %24 : vector<8x256xf32> to vector<8x256xbf16>
    %c0_18 = arith.constant 0 : index
    %c0_19 = arith.constant 0 : index
    %26 = vector.load %arg8[%c0_18, %c0_19] : memref<256x128xbf16, #tpu.memory_space<vmem>>, vector<256x128xbf16>
    %cst_20 = arith.constant dense<0.000000e+00> : vector<8x128xf32>
    %27 = tpu.matmul %25, %26, %cst_20 {dimension_numbers = #tpu.dot_dimension_numbers<[1], [0], [0], [1], [0, 0, 1, 1], [], []>} : vector<8x256xbf16>, vector<256x128xbf16>, vector<8x128xf32> -> vector<8x128xf32>
    %c0_21 = arith.constant 0 : index
    %c0_22 = arith.constant 0 : index
    %28 = vector.load %arg9[%c0_21, %c0_22] : memref<1x128xf32, #tpu.memory_space<vmem>>, vector<1x128xf32>
    %29 = vector.broadcast %28 : vector<1x128xf32> to vector<8x128xf32>
    %30 = arith.addf %27, %29 : vector<8x128xf32>
    %cst_23 = arith.constant 0.000000e+00 : f32
    %31 = vector.broadcast %cst_23 : f32 to vector<8x128xf32>
    %32 = arith.maximumf %30, %31 : vector<8x128xf32>
    %33 = arith.truncf %32 : vector<8x128xf32> to vector<8x128xbf16>
    %c0_24 = arith.constant 0 : index
    %c0_25 = arith.constant 0 : index
    %34 = vector.load %arg10[%c0_24, %c0_25] : memref<128x128xbf16, #tpu.memory_space<vmem>>, vector<128x128xbf16>
    %cst_26 = arith.constant dense<0.000000e+00> : vector<8x128xf32>
    %35 = tpu.matmul %33, %34, %cst_26 {dimension_numbers = #tpu.dot_dimension_numbers<[1], [0], [0], [1], [0, 0, 1, 1], [], []>} : vector<8x128xbf16>, vector<128x128xbf16>, vector<8x128xf32> -> vector<8x128xf32>
    %c0_27 = arith.constant 0 : index
    %c0_28 = arith.constant 0 : index
    %36 = vector.load %arg11[%c0_27, %c0_28] : memref<1x128xf32, #tpu.memory_space<vmem>>, vector<1x128xf32>
    %37 = vector.broadcast %36 : vector<1x128xf32> to vector<8x128xf32>
    %38 = arith.addf %35, %37 : vector<8x128xf32>
    %cst_29 = arith.constant 0.000000e+00 : f32
    %39 = vector.broadcast %cst_29 : f32 to vector<8x128xf32>
    %40 = arith.maximumf %38, %39 : vector<8x128xf32>
    %41 = arith.truncf %40 : vector<8x128xf32> to vector<8x128xbf16>
    %c0_30 = arith.constant 0 : index
    %c0_31 = arith.constant 0 : index
    %42 = vector.load %arg12[%c0_30, %c0_31] : memref<128x128xbf16, #tpu.memory_space<vmem>>, vector<128x128xbf16>
    %cst_32 = arith.constant dense<0.000000e+00> : vector<8x128xf32>
    %43 = tpu.matmul %41, %42, %cst_32 {dimension_numbers = #tpu.dot_dimension_numbers<[1], [0], [0], [1], [0, 0, 1, 1], [], []>} : vector<8x128xbf16>, vector<128x128xbf16>, vector<8x128xf32> -> vector<8x128xf32>
    %c0_33 = arith.constant 0 : index
    %c0_34 = arith.constant 0 : index
    %44 = vector.load %arg13[%c0_33, %c0_34] : memref<1x128xf32, #tpu.memory_space<vmem>>, vector<1x128xf32>
    %45 = vector.broadcast %44 : vector<1x128xf32> to vector<8x128xf32>
    %46 = arith.addf %43, %45 : vector<8x128xf32>
    %c0_35 = arith.constant 0 : index
    %c0_36 = arith.constant 0 : index
    %47 = vector.load %arg14[%c0_35, %c0_36] : memref<8x128xf32, #tpu.memory_space<vmem>>, vector<8x128xf32>
    tpu.vector_store %arg14[%c0_35, %c0_36], %46 {strides = array<i32>} : memref<8x128xf32, #tpu.memory_space<vmem>>, vector<8x128xf32>,
    return
  }
  func.func @transform_0(%arg0: i32) -> (i32, i32) {
    %c0_i32 = arith.constant 0 : i32
    %c0_i32_0 = arith.constant 0 : i32
    return %arg0, %c0_i32 : i32, i32
  }
  func.func @transform_1(%arg0: i32) -> (i32, i32) {
    %c0_i32 = arith.constant 0 : i32
    %c0_i32_0 = arith.constant 0 : i32
    %c0_i32_1 = arith.constant 0 : i32
    return %c0_i32, %c0_i32_0 : i32, i32
  }
  func.func @transform_2(%arg0: i32) -> (i32, i32) {
    %c0_i32 = arith.constant 0 : i32
    %c0_i32_0 = arith.constant 0 : i32
    %c0_i32_1 = arith.constant 0 : i32
    return %c0_i32, %c0_i32_0 : i32, i32
  }
  func.func @transform_3(%arg0: i32) -> (i32, i32) {
    %c0_i32 = arith.constant 0 : i32
    %c0_i32_0 = arith.constant 0 : i32
    %c0_i32_1 = arith.constant 0 : i32
    return %c0_i32, %c0_i32_0 : i32, i32
  }
  func.func @transform_4(%arg0: i32) -> (i32, i32) {
    %c0_i32 = arith.constant 0 : i32
    %c0_i32_0 = arith.constant 0 : i32
    %c0_i32_1 = arith.constant 0 : i32
    return %c0_i32, %c0_i32_0 : i32, i32
  }
  func.func @transform_5(%arg0: i32) -> (i32, i32) {
    %c0_i32 = arith.constant 0 : i32
    %c0_i32_0 = arith.constant 0 : i32
    %c0_i32_1 = arith.constant 0 : i32
    return %c0_i32, %c0_i32_0 : i32, i32
  }
  func.func @transform_6(%arg0: i32) -> (i32, i32) {
    %c0_i32 = arith.constant 0 : i32
    %c0_i32_0 = arith.constant 0 : i32
    %c0_i32_1 = arith.constant 0 : i32
    return %c0_i32, %c0_i32_0 : i32, i32
  }
  func.func @transform_7(%arg0: i32) -> (i32, i32) {
    %c0_i32 = arith.constant 0 : i32
    %c0_i32_0 = arith.constant 0 : i32
    %c0_i32_1 = arith.constant 0 : i32
    return %c0_i32, %c0_i32_0 : i32, i32
  }
  func.func @transform_8(%arg0: i32) -> (i32, i32) {
    %c0_i32 = arith.constant 0 : i32
    %c0_i32_0 = arith.constant 0 : i32
    %c0_i32_1 = arith.constant 0 : i32
    return %c0_i32, %c0_i32_0 : i32, i32
  }
  func.func @transform_9(%arg0: i32) -> (i32, i32) {
    %c0_i32 = arith.constant 0 : i32
    %c0_i32_0 = arith.constant 0 : i32
    %c0_i32_1 = arith.constant 0 : i32
    return %c0_i32, %c0_i32_0 : i32, i32
  }
  func.func @transform_10(%arg0: i32) -> (i32, i32) {
    %c0_i32 = arith.constant 0 : i32
    %c0_i32_0 = arith.constant 0 : i32
    %c0_i32_1 = arith.constant 0 : i32
    return %c0_i32, %c0_i32_0 : i32, i32
  }
  func.func @transform_11(%arg0: i32) -> (i32, i32) {
    %c0_i32 = arith.constant 0 : i32
    %c0_i32_0 = arith.constant 0 : i32
    %c0_i32_1 = arith.constant 0 : i32
    return %c0_i32, %c0_i32_0 : i32, i32
  }
  func.func @transform_12(%arg0: i32) -> (i32, i32) {
    %c0_i32 = arith.constant 0 : i32
    %c0_i32_0 = arith.constant 0 : i32
    %c0_i32_1 = arith.constant 0 : i32
    return %c0_i32, %c0_i32_0 : i32, i32
  }
  func.func @transform_13(%arg0: i32) -> (i32, i32) {
    %c0_i32 = arith.constant 0 : i32
    %c0_i32_0 = arith.constant 0 : i32
    return %arg0, %c0_i32 : i32, i32
  }
}

</mosaic_0001>

<bundles_post_ra>
// kernel: tpu_custom_call.1
= control target key start
LH: loop header
LB: loop body
LE: loop exit
PB: predicated region body
PF: predicated region fallthrough
CT: control target
= control target key end

     0   :  { %18 = vsyncpa [#allocation3], 0  ;;  %s4137_s0 = inlined_call_operand.hbm [shape: f32[8,3072], index: 0, kind: input, shape index: {}]   ;;  %s4138_s1 = inlined_call_operand.hbm [shape: bf16[3072,128], index: 1, kind: input, shape index: {}]   ;;  %s4139_s2 = inlined_call_operand.vmem [shape: f32[1,128], index: 2, kind: input, shape index: {}]   ;;  %s4140_s3 = inlined_call_operand.hbm [shape: bf16[128,128], index: 3, kind: input, shape index: {}]   ;;  %s4141_s4 = inlined_call_operand.vmem [shape: f32[1,128], index: 4, kind: input, shape index: {}]   ;;  %s4142_s5 = inlined_call_operand.hbm [shape: bf16[128,256], index: 5, kind: input, shape index: {}]   ;;  %s4143_s6 = inlined_call_operand.vmem [shape: f32[1,256], index: 6, kind: input, shape index: {}]   ;;  %s4144_s7 = inlined_call_operand.hbm [shape: bf16[256,128], index: 7, kind: input, shape index: {}]   ;;  %s4145_s8 = inlined_call_operand.vmem [shape: f32[1,128], index: 8, kind: input, shape index: {}]   ;;  %s4146_s9 = inlined_call_operand.hbm [shape: bf16[128,128], index: 9, kind: input, shape index: {}]   ;;  %s4147_s10 = inlined_call_operand.vmem [shape: f32[1,128], index: 10, kind: input, shape index: {}]   ;;  %s4148_s11 = inlined_call_operand.hbm [shape: bf16[128,128], index: 11, kind: input, shape index: {}]   ;;  %s4149_s12 = inlined_call_operand.vmem [shape: f32[1,128], index: 12, kind: input, shape index: {}]   ;;  %s4150_s13 = inlined_call_operand.hbm [shape: f32[8,128], index: 13, kind: output, shape index: {}]  }
   0x1   :  { %19 = vsyncpa [#allocation6], 0 }
   0x2   :  { %20 = vsyncpa [#allocation9], 0 }
   0x3   :  { %21 = vsyncpa [#allocation12], 0 }
   0x4   :  { %22 = vsyncpa [#allocation4], 0  ;;  %s3965_s25 = smov [#allocation5]  }
   0x5   :  { %s38_s26 = sshll.u32 %s3965_s25, 4  ;;  %s39_s26 = int_to_ptr.vmem [resolvable:$true] %s38_s26 }
   0x6   :  { %s3803_s27 = scalar_lea.vmem %s39_s26, 24576  ;;  %p3808_p1 = scmp.lt.s32.totalorder %s39_s26, %s39_s26 }
   0x7   :  { %p3804_p0 = scmp.ne.s32.totalorder %s39_s26, %s3803_s27  ;;  %p3809_p2 = scmp.lt.s32.totalorder %s3803_s27, %s3803_s27 }
   0x9   :  { %p3810_p3 = por %p3809_p2, %p3808_p1 }
   0xb   :  { %p3811_p4 = pnand %p3810_p3, %p3804_p0 }
   0xd   :  { %3814 = shalt.err (!%p3811_p4)
}
   0xe   :  { %s3966_s28 = smov 64   ;;  %s3967_s29 = smov 4  }
   0xf   :  { %44 = dma.hbm_to_vmem [thread:$0]  %s4138_s1, 24576, %s39_s26, [#allocation6], %s3966_s28, %s3966_s28, %s3967_s29  }
  0x10   :  { %s3968_s15 = smov [#allocation8]  }
  0x11   :  { %s66_s16 = sshll.u32 %s3968_s15, 4  ;;  %s67_s16 = int_to_ptr.vmem [resolvable:$true] %s66_s16 }
  0x12   :  { %s3823_s17 = scalar_lea.vmem %s67_s16, 2048  ;;  %p3828_p6 = scmp.lt.s32.totalorder %s67_s16, %s67_s16 }
  0x13   :  { %p3824_p5 = scmp.ne.s32.totalorder %s67_s16, %s3823_s17  ;;  %p3829_p7 = scmp.lt.s32.totalorder %s3823_s17, %s3823_s17 }
  0x15   :  { %p3830_p8 = por %p3829_p7, %p3828_p6 }
  0x17   :  { %p3831_p9 = pnand %p3830_p8, %p3824_p5 }
  0x19   :  { %3834 = shalt.err (!%p3831_p9)
}
  0x1a   :  { %s3969_s18 = smov 128   ;;  %s3970_s19 = smov 8  }
  0x1b   :  { %72 = dma.hbm_to_vmem [thread:$0]  %s4142_s5, 2048, %s67_s16, [#allocation9], %s3969_s18, %s3969_s18, %s3970_s19  }
  0x1c   :  { %s3971_s22 = smov [#allocation11]   ;;  %s3972_s24 = smov [#allocation2]  }
  0x1d   :  { %s94_s23 = sshll.u32 %s3971_s22, 4  ;;  %s29_s1 = sshll.u32 %s3972_s24, 4  ;;  %s95_s23 = int_to_ptr.vmem [resolvable:$true] %s94_s23  ;;  %s30_s1 = int_to_ptr.vmem [resolvable:$true] %s29_s1 }
  0x1e   :  { %s3843_s25 = scalar_lea.vmem %s95_s23, 1024  ;;  %p3848_p11 = scmp.lt.s32.totalorder %s95_s23, %s95_s23 }
  0x1f   :  { %p3844_p10 = scmp.ne.s32.totalorder %s95_s23, %s3843_s25  ;;  %p3849_p12 = scmp.lt.s32.totalorder %s3843_s25, %s3843_s25 }
  0x21   :  { %p3850_p13 = por %p3849_p12, %p3848_p11 }
  0x23   :  { %p3851_p0 = pnand %p3850_p13, %p3844_p10 }
  0x25   :  { %3854 = shalt.err (!%p3851_p0)
}
  0x26   :  { %100 = dma.hbm_to_vmem [thread:$0]  %s4146_s9, 1024, %s95_s23, [#allocation12], %s3966_s28, %s3966_s28, %s3967_s29  }
  0x27   :  { %s3863_s5 = scalar_lea.vmem %s30_s1, 3072  ;;  %p3868_p2 = scmp.lt.s32.totalorder %s30_s1, %s30_s1 }
  0x28   :  { %p3864_p1 = scmp.ne.s32.totalorder %s30_s1, %s3863_s5  ;;  %p3869_p3 = scmp.lt.s32.totalorder %s3863_s5, %s3863_s5 }
  0x2a   :  { %p3870_p4 = por %p3869_p3, %p3868_p2 }
  0x2c   :  { %p3871_p5 = pnand %p3870_p4, %p3864_p1 }
  0x2e   :  { %3874 = shalt.err (!%p3871_p5)
}
  0x2f   :  { %32 = dma.hbm_to_vmem [thread:$0]  %s4137_s0, 3072, %s30_s1, [#allocation3]  }
  0x30   :  { %s3973_s15 = smov [#allocation7]   ;;  %s3974_s17 = smov [#allocation10]  }
  0x31   :  { %s52_s16 = sshll.u32 %s3973_s15, 4  ;;  %s80_s18 = sshll.u32 %s3974_s17, 4  ;;  %s53_s16 = int_to_ptr.vmem [resolvable:$true] %s52_s16  ;;  %s81_s18 = int_to_ptr.vmem [resolvable:$true] %s80_s18 }
  0x32   :  { %s3883_s19 = scalar_lea.vmem %s53_s16, 1024  ;;  %p3888_p7 = scmp.lt.s32.totalorder %s53_s16, %s53_s16 }
  0x33   :  { %p3884_p6 = scmp.ne.s32.totalorder %s53_s16, %s3883_s19  ;;  %p3889_p8 = scmp.lt.s32.totalorder %s3883_s19, %s3883_s19 }
  0x35   :  { %p3890_p9 = por %p3889_p8, %p3888_p7 }
  0x37   :  { %p3891_p10 = pnand %p3890_p9, %p3884_p6 }
  0x39   :  { %3894 = shalt.err (!%p3891_p10)
}
  0x3a   :  { %58 = dma.hbm_to_vmem [thread:$0]  %s4140_s3, 1024, %s53_s16, [#allocation6], %s3966_s28, %s3966_s28, %s3967_s29  }
  0x3b   :  { %s3903_s0 = scalar_lea.vmem %s81_s18, 2048  ;;  %p3908_p12 = scmp.lt.s32.totalorder %s81_s18, %s81_s18 }
  0x3c   :  { %p3904_p11 = scmp.ne.s32.totalorder %s81_s18, %s3903_s0  ;;  %p3909_p13 = scmp.lt.s32.totalorder %s3903_s0, %s3903_s0 }
  0x3e   :  { %p3910_p0 = por %p3909_p13, %p3908_p12 }
  0x40   :  { %p3911_p1 = pnand %p3910_p0, %p3904_p11 }
  0x42   :  { %3914 = shalt.err (!%p3911_p1)
}
  0x43   :  { %86 = dma.hbm_to_vmem [thread:$0]  %s4144_s7, 2048, %s81_s18, [#allocation9], %s3966_s28, %s3966_s28, %s3967_s29  }
  0x44   :  { %s3975_s23 = smov [#allocation13]  }
  0x45   :  { %s108_s24 = sshll.u32 %s3975_s23, 4  ;;  %s109_s24 = int_to_ptr.vmem [resolvable:$true] %s108_s24 }
  0x46   :  { %s3923_s1 = scalar_lea.vmem %s109_s24, 1024  ;;  %p3928_p3 = scmp.lt.s32.totalorder %s109_s24, %s109_s24 }
  0x47   :  { %p3924_p2 = scmp.ne.s32.totalorder %s109_s24, %s3923_s1  ;;  %p3929_p4 = scmp.lt.s32.totalorder %s3923_s1, %s3923_s1 }
  0x49   :  { %p3930_p5 = por %p3929_p4, %p3928_p3 }
  0x4b   :  { %p3931_p6 = pnand %p3930_p5, %p3924_p2 }
  0x4d   :  { %3934 = shalt.err (!%p3931_p6)
}
  0x4e   :  { %114 = dma.hbm_to_vmem [thread:$0]  %s4148_s11, 1024, %s109_s24, [#allocation12], %s3966_s28, %s3966_s28, %s3967_s29  }
  0x4f   :  { %3955 = dma.done.wait [#allocation3], 3072  }
  0x50   :  { %3956 = vsyncadd [#allocation3], 4294964224 }
  0x51   :  { %3957 = dma.done.wait [#allocation6], 25600  }
  0x52   :  { %3958 = vsyncadd [#allocation6], 4294941696 }
  0x53   :  { %3959 = dma.done.wait [#allocation9], 4096  }
  0x54   :  { %3960 = vsyncadd [#allocation9], 4294963200 }
  0x55   :  { %3961 = dma.done.wait [#allocation12], 2048  }
  0x56   :  { %3962 = vsyncadd [#allocation12], 4294965248  ;;  %v3539_v0 = vld [vmem:[#allocation5 + $0x78] sm:$0xff]   ;;  %v3543_v4 = vld [vmem:[#allocation5 + $0x70] sm:$0xff]   ;;  %vm3977_vm0 = vmmov 0   ;;  %s3979_s14 = smov [#allocation14]  }
  0x57   :  { %v3540_v1 = vld [vmem:[#allocation5 + $0xf8] sm:$0xff]   ;;  %3151 = vmatprep.subr.bf16.mxu0 %v3539_v0  ;;  %v3544_v5 = vld [vmem:[#allocation5 + $0xf0] sm:$0xff]   ;;  %v3547_v8 = vld [vmem:[#allocation5 + $0x68] sm:$0xff]   ;;  %s2886_s15 = sshll.u32 %s3979_s14, 4  ;;  %s2887_s15 = int_to_ptr.vmem [resolvable:$true] %s2886_s15 }
  0x58   :  { %v3541_v2 = vld [vmem:[#allocation5 + $0x38] sm:$0xff]   ;;  %3173 = vmatprep.subr.bf16.mxu1 %v3540_v1  ;;  %v3545_v6 = vld [vmem:[#allocation5 + $0x30] sm:$0xff]   ;;  %v3548_v9 = vld [vmem:[#allocation5 + $0xe8] sm:$0xff]   ;;  %p3940_p8 = scmp.lt.s32.totalorder %s2887_s15, %s2887_s15 }
  0x59   :  { %v3542_v3 = vld [vmem:[#allocation5 + $0xb8] sm:$0xff]   ;;  %3152 = vmatpush3.bf16.msra.mxu0 %v3541_v2  ;;  %v3546_v7 = vld [vmem:[#allocation5 + $0xb0] sm:$0xff]   ;;  %v3549_v10 = vld [vmem:[#allocation5 + $0x28] sm:$0xff]  }
  0x5a   :  { %3174 = vmatpush3.bf16.msra.mxu1 %v3542_v3  ;;  %3153 = vmatprep.subr.bf16.mxu0 %v3543_v4  ;;  %v3550_v11 = vld [vmem:[#allocation5 + $0xa8] sm:$0xff]   ;;  %v3551_v12 = vld [vmem:[#allocation5 + $0x60] sm:$0xff]   ;;  %v3555_v16 = vld [vmem:[#allocation5 + $0x58] sm:$0xff]  }
  0x5b   :  { %3175 = vmatprep.subr.bf16.mxu1 %v3544_v5  ;;  %v3552_v13 = vld [vmem:[#allocation5 + $0xe0] sm:$0xff]   ;;  %v3556_v17 = vld [vmem:[#allocation5 + $0xd8] sm:$0xff]   ;;  %v3559_v20 = vld [vmem:[#allocation5 + $0x50] sm:$0xff]  }
  0x5c   :  { %v3553_v14 = vld [vmem:[#allocation5 + $0x20] sm:$0xff]   ;;  %v3557_v18 = vld [vmem:[#allocation5 + $0x18] sm:$0xff]   ;;  %v3560_v21 = vld [vmem:[#allocation5 + $0xd0] sm:$0xff]  }
  0x5d   :  { %3154 = vmatpush3.bf16.msra.mxu0 %v3545_v6  ;;  %v3554_v15 = vld [vmem:[#allocation5 + $0xa0] sm:$0xff]   ;;  %v3558_v19 = vld [vmem:[#allocation5 + $0x98] sm:$0xff]   ;;  %v3561_v22 = vld [vmem:[#allocation5 + $0x10] sm:$0xff]  }
  0x5e   :  { %3176 = vmatpush3.bf16.msra.mxu1 %v3546_v7  ;;  %3155 = vmatprep.subr.bf16.mxu0 %v3547_v8  ;;  %v3562_v23 = vld [vmem:[#allocation5 + $0x90] sm:$0xff]   ;;  %v3563_v24 = vld [vmem:[#allocation5 + $0x48] sm:$0xff]   ;;  %v3567_v28 = vld [vmem:[#allocation5 + $0x40] sm:$0xff]  }
  0x5f   :  { %3177 = vmatprep.subr.bf16.mxu1 %v3548_v9  ;;  %v3564_v25 = vld [vmem:[#allocation5 + $0xc8] sm:$0xff]   ;;  %v3568_v29 = vld [vmem:[#allocation5 + $0xc0] sm:$0xff]   ;;  %v142_v33 = vld [vmem:[#allocation2 + $0x18] sm:$0xff] }
  0x60   :  { %v3565_v26 = vld [vmem:[#allocation5 + $0x8] sm:$0xff]   ;;  %v3569_v30 = vld [vmem:[#allocation5] sm:$0xff]   ;;  %v166_v36 = vpack.c.bf16 %v142_v33, %v142_v33  ;;  %v141_v38 = vld [vmem:[#allocation2 + $0x10] sm:$0xff] }
  0x61   :  { %3156 = vmatpush3.bf16.msra.mxu0 %v3549_v10  ;;  %v3566_v27 = vld [vmem:[#allocation5 + $0x88] sm:$0xff]   ;;  %v3570_v31 = vld [vmem:[#allocation5 + $0x80] sm:$0xff]   ;;  %v165_v39 = vpack.c.bf16 %v141_v38, %v141_v38  ;;  %v3571_v40 = vld [vmem:[#allocation5 + $0x178] sm:$0xff]  }
  0x62   :  { %3178 = vmatpush3.bf16.msra.mxu1 %v3550_v11  ;;  %3157 = vmatprep.subr.bf16.mxu0 %v3551_v12  ;;  %v140_v32 = vld [vmem:[#allocation2 + $0x8] sm:$0xff]  ;;  %v139_v34 = vld [vmem:[#allocation2] sm:$0xff]  ;;  %v3572_v41 = vld [vmem:[#allocation5 + $0x1f8] sm:$0xff]  }
  0x63   :  { %3179 = vmatprep.subr.bf16.mxu1 %v3552_v13  ;;  %v164_v35 = vpack.c.bf16 %v140_v32, %v140_v32  ;;  %v163_v37 = vpack.c.bf16 %v139_v34, %v139_v34  ;;  %1802 = vmatprep.mubr.bf16.mxu1 %v166_v36  ;;  %v3573_v42 = vld [vmem:[#allocation5 + $0x138] sm:$0xff]   ;;  %v3575_v44 = vld [vmem:[#allocation5 + $0x170] sm:$0xff]   ;;  %v3579_v48 = vld [vmem:[#allocation5 + $0x168] sm:$0xff]  }
  0x64   :  { %v3574_v43 = vld [vmem:[#allocation5 + $0x1b8] sm:$0xff]   ;;  %v3576_v45 = vld [vmem:[#allocation5 + $0x1f0] sm:$0xff]   ;;  %v3580_v49 = vld [vmem:[#allocation5 + $0x1e8] sm:$0xff]  }
  0x65   :  { %3158 = vmatpush3.bf16.msra.mxu0 %v3553_v14  ;;  %1762 = vmatprep.mubr.bf16.mxu0 %v164_v35  ;;  %v3577_v46 = vld [vmem:[#allocation5 + $0x130] sm:$0xff]   ;;  %v3581_v50 = vld [vmem:[#allocation5 + $0x128] sm:$0xff]   ;;  %v3583_v52 = vld [vmem:[#allocation5 + $0x160] sm:$0xff]  }
  0x66   :  { %3180 = vmatpush3.bf16.msra.mxu1 %v3554_v15  ;;  %3159 = vmatprep.subr.bf16.mxu0 %v3555_v16  ;;  %v3578_v47 = vld [vmem:[#allocation5 + $0x1b0] sm:$0xff]   ;;  %v3582_v51 = vld [vmem:[#allocation5 + $0x1a8] sm:$0xff]   ;;  %v3584_v53 = vld [vmem:[#allocation5 + $0x1e0] sm:$0xff]  }
  0x67   :  { %3181 = vmatprep.subr.bf16.mxu1 %v3556_v17  ;;  %v3585_v54 = vld [vmem:[#allocation5 + $0x120] sm:$0xff]   ;;  %v3587_v56 = vld [vmem:[#allocation5 + $0x158] sm:$0xff]   ;;  %v3591_v60 = vld [vmem:[#allocation5 + $0x150] sm:$0xff]  }
  0x68   :  { %v3586_v55 = vld [vmem:[#allocation5 + $0x1a0] sm:$0xff]   ;;  %v3588_v57 = vld [vmem:[#allocation5 + $0x1d8] sm:$0xff]   ;;  %v3592_v61 = vld [vmem:[#allocation5 + $0x1d0] sm:$0xff]  }
  0x69   :  { %3160 = vmatpush3.bf16.msra.mxu0 %v3557_v18  ;;  %v3589_v58 = vld [vmem:[#allocation5 + $0x118] sm:$0xff]   ;;  %v3593_v62 = vld [vmem:[#allocation5 + $0x110] sm:$0xff]   ;;  %v3595_v0 = vld [vmem:[#allocation5 + $0x148] sm:$0xff]  }
  0x6a   :  { %3182 = vmatpush3.bf16.msra.mxu1 %v3558_v19  ;;  %3161 = vmatprep.subr.bf16.mxu0 %v3559_v20  ;;  %v3590_v59 = vld [vmem:[#allocation5 + $0x198] sm:$0xff]   ;;  %v3594_v63 = vld [vmem:[#allocation5 + $0x190] sm:$0xff]   ;;  %v3596_v1 = vld [vmem:[#allocation5 + $0x1c8] sm:$0xff]  }
  0x6b   :  { %3183 = vmatprep.subr.bf16.mxu1 %v3560_v21  ;;  %v3597_v2 = vld [vmem:[#allocation5 + $0x108] sm:$0xff]   ;;  %v3599_v4 = vld [vmem:[#allocation5 + $0x140] sm:$0xff]   ;;  %v146_v9 = vld [vmem:[#allocation2 + $0x38] sm:$0xff] }
  0x6c   :  { %v3598_v3 = vld [vmem:[#allocation5 + $0x188] sm:$0xff]   ;;  %v3600_v5 = vld [vmem:[#allocation5 + $0x1c0] sm:$0xff]   ;;  %v170_v11 = vpack.c.bf16 %v146_v9, %v146_v9  ;;  %v145_v13 = vld [vmem:[#allocation2 + $0x30] sm:$0xff] }
  0x6d   :  { %3162 = vmatpush3.bf16.msra.mxu0 %v3561_v22  ;;  %v3601_v6 = vld [vmem:[#allocation5 + $0x100] sm:$0xff]   ;;  %v144_v8 = vld [vmem:[#allocation2 + $0x28] sm:$0xff]  ;;  %v169_v15 = vpack.c.bf16 %v145_v13, %v145_v13  ;;  %v3603_v16 = vld [vmem:[#allocation5 + $0x278] sm:$0xff]  }
  0x6e   :  { %3184 = vmatpush3.bf16.msra.mxu1 %v3562_v23  ;;  %3163 = vmatprep.subr.bf16.mxu0 %v3563_v24  ;;  %v3602_v7 = vld [vmem:[#allocation5 + $0x180] sm:$0xff]   ;;  %v168_v10 = vpack.c.bf16 %v144_v8, %v144_v8  ;;  %v3604_v17 = vld [vmem:[#allocation5 + $0x2f8] sm:$0xff]   ;;  %v3607_v20 = vld [vmem:[#allocation5 + $0x270] sm:$0xff]  }
  0x6f   :  { %3185 = vmatprep.subr.bf16.mxu1 %v3564_v25  ;;  %v143_v12 = vld [vmem:[#allocation2 + $0x20] sm:$0xff]  ;;  %v3605_v18 = vld [vmem:[#allocation5 + $0x238] sm:$0xff]   ;;  %v3608_v21 = vld [vmem:[#allocation5 + $0x2f0] sm:$0xff]  }
  0x70   :  { %v167_v14 = vpack.c.bf16 %v143_v12, %v143_v12  ;;  %v3606_v19 = vld [vmem:[#allocation5 + $0x2b8] sm:$0xff]   ;;  %v3609_v22 = vld [vmem:[#allocation5 + $0x230] sm:$0xff]   ;;  %v3611_v24 = vld [vmem:[#allocation5 + $0x268] sm:$0xff]  }
  0x71   :  { %3164 = vmatpush3.bf16.msra.mxu0 %v3565_v26  ;;  %v3610_v23 = vld [vmem:[#allocation5 + $0x2b0] sm:$0xff]   ;;  %v3612_v25 = vld [vmem:[#allocation5 + $0x2e8] sm:$0xff]   ;;  %v3619_v32 = vld [vmem:[#allocation5 + $0x258] sm:$0xff]  }
  0x72   :  { %3186 = vmatpush3.bf16.msra.mxu1 %v3566_v27  ;;  %3165 = vmatprep.subr.bf16.mxu0 %v3567_v28  ;;  %v3613_v26 = vld [vmem:[#allocation5 + $0x228] sm:$0xff]   ;;  %v3615_v28 = vld [vmem:[#allocation5 + $0x260] sm:$0xff]   ;;  %v3620_v33 = vld [vmem:[#allocation5 + $0x2d8] sm:$0xff]  }
  0x73   :  { %3187 = vmatprep.subr.bf16.mxu1 %v3568_v29  ;;  %v3614_v27 = vld [vmem:[#allocation5 + $0x2a8] sm:$0xff]   ;;  %v3616_v29 = vld [vmem:[#allocation5 + $0x2e0] sm:$0xff]   ;;  %v3621_v34 = vld [vmem:[#allocation5 + $0x218] sm:$0xff]  }
  0x74   :  { %v3622_v35 = vld [vmem:[#allocation5 + $0x298] sm:$0xff]   ;;  %v3623_v36 = vld [vmem:[#allocation5 + $0x250] sm:$0xff]  }
  0x75   :  { %3166 = vmatpush3.bf16.msra.mxu0 %v3569_v30  ;;  %v3617_v30 = vld [vmem:[#allocation5 + $0x220] sm:$0xff]   ;;  %v3625_v38 = vld [vmem:[#allocation5 + $0x210] sm:$0xff]   ;;  %v3651_v8 = vld [vmem:[#allocation5 + $0x358] sm:$0xff]  }
  0x76   :  { %3188 = vmatpush3.bf16.msra.mxu1 %v3570_v31  ;;  %3195 = vmatprep.subr.bf16.mxu0 %v3571_v40  ;;  %v3618_v31 = vld [vmem:[#allocation5 + $0x2a0] sm:$0xff]   ;;  %v3627_v40 = vld [vmem:[#allocation5 + $0x248] sm:$0xff]   ;;  %v3652_v9 = vld [vmem:[#allocation5 + $0x3d8] sm:$0xff]  }
  0x77   :  { %3217 = vmatprep.subr.bf16.mxu1 %v3572_v41  ;;  %v3628_v41 = vld [vmem:[#allocation5 + $0x2c8] sm:$0xff]   ;;  %v3655_v12 = vld [vmem:[#allocation5 + $0x350] sm:$0xff]  }
  0x78   :  { %1763 = vmatmul.mubr.bf16.vlgmr.msra.gmra.mxu0 %v163_v37  ;;  %v3624_v37 = vld [vmem:[#allocation5 + $0x2d0] sm:$0xff]  }
  0x79   :  { %1803 = vmatmul.mubr.bf16.vlgmr.msra.gmra.mxu1 %v165_v39  ;;  %3196 = vmatpush3.bf16.msra.mxu0 %v3573_v42  ;;  %v3626_v39 = vld [vmem:[#allocation5 + $0x290] sm:$0xff]   ;;  %v3629_v42 = vld [vmem:[#allocation5 + $0x208] sm:$0xff]  }
  0x7a   :  { %3218 = vmatpush3.bf16.msra.mxu1 %v3574_v43  ;;  %3197 = vmatprep.subr.bf16.mxu0 %v3575_v44  ;;  %v3630_v43 = vld [vmem:[#allocation5 + $0x288] sm:$0xff]   ;;  %v3631_v44 = vld [vmem:[#allocation5 + $0x240] sm:$0xff]   ;;  %v3656_v13 = vld [vmem:[#allocation5 + $0x3d0] sm:$0xff]  }
  0x7b   :  { %3219 = vmatprep.subr.bf16.mxu1 %v3576_v45  ;;  %1842 = vmatprep.mubr.bf16.mxu0 %v168_v10  ;;  %v3632_v45 = vld [vmem:[#allocation5 + $0x2c0] sm:$0xff]   ;;  %v3653_v10 = vld [vmem:[#allocation5 + $0x318] sm:$0xff]  }
  0x7c   :  { %1882 = vmatprep.mubr.bf16.mxu1 %v170_v11  ;;  %v3654_v11 = vld [vmem:[#allocation5 + $0x398] sm:$0xff]  }
  0x7d   :  { %3198 = vmatpush3.bf16.msra.mxu0 %v3577_v46  ;;  %v3633_v46 = vld [vmem:[#allocation5 + $0x200] sm:$0xff]  }
  0x7e   :  { %3220 = vmatpush3.bf16.msra.mxu1 %v3578_v47  ;;  %3199 = vmatprep.subr.bf16.mxu0 %v3579_v48  ;;  %v3634_v47 = vld [vmem:[#allocation5 + $0x280] sm:$0xff]   ;;  %v148_v48 = vld [vmem:[#allocation2 + $0x48] sm:$0xff] }
  0x7f   :  { %3221 = vmatprep.subr.bf16.mxu1 %v3580_v49  ;;  %v172_v49 = vpack.c.bf16 %v148_v48, %v148_v48  ;;  %v3683_v48 = vld [vmem:[#allocation5 + $0x458] sm:$0xff]  }
  0x81   :  { %3200 = vmatpush3.bf16.msra.mxu0 %v3581_v50  ;;  %v150_v50 = vld [vmem:[#allocation2 + $0x58] sm:$0xff] }
  0x82   :  { %3222 = vmatpush3.bf16.msra.mxu1 %v3582_v51  ;;  %3201 = vmatprep.subr.bf16.mxu0 %v3583_v52  ;;  %v147_v51 = vld [vmem:[#allocation2 + $0x40] sm:$0xff]  ;;  %v149_v52 = vld [vmem:[#allocation2 + $0x50] sm:$0xff] }
  0x83   :  { %3223 = vmatprep.subr.bf16.mxu1 %v3584_v53  ;;  %v174_v53 = vpack.c.bf16 %v150_v50, %v150_v50  ;;  %v3685_v50 = vld [vmem:[#allocation5 + $0x418] sm:$0xff]  }
  0x85   :  { %3202 = vmatpush3.bf16.msra.mxu0 %v3585_v54  ;;  %v171_v54 = vpack.c.bf16 %v147_v51, %v147_v51  ;;  %v3686_v51 = vld [vmem:[#allocation5 + $0x498] sm:$0xff]  }
  0x86   :  { %3224 = vmatpush3.bf16.msra.mxu1 %v3586_v55  ;;  %3203 = vmatprep.subr.bf16.mxu0 %v3587_v56  ;;  %v173_v55 = vpack.c.bf16 %v149_v52, %v149_v52  ;;  %v3635_v56 = vld [vmem:[#allocation5 + $0x378] sm:$0xff]   ;;  %v3687_v52 = vld [vmem:[#allocation5 + $0x450] sm:$0xff]  }
  0x87   :  { %3225 = vmatprep.subr.bf16.mxu1 %v3588_v57  ;;  %v3636_v57 = vld [vmem:[#allocation5 + $0x3f8] sm:$0xff]  }
  0x89   :  { %3204 = vmatpush3.bf16.msra.mxu0 %v3589_v58  ;;  %v3637_v58 = vld [vmem:[#allocation5 + $0x338] sm:$0xff]  }
  0x8a   :  { %3226 = vmatpush3.bf16.msra.mxu1 %v3590_v59  ;;  %3205 = vmatprep.subr.bf16.mxu0 %v3591_v60  ;;  %v3638_v59 = vld [vmem:[#allocation5 + $0x3b8] sm:$0xff]   ;;  %v3639_v60 = vld [vmem:[#allocation5 + $0x370] sm:$0xff]  }
  0x8b   :  { %3227 = vmatprep.subr.bf16.mxu1 %v3592_v61  ;;  %v3640_v61 = vld [vmem:[#allocation5 + $0x3f0] sm:$0xff]  }
  0x8d   :  { %3206 = vmatpush3.bf16.msra.mxu0 %v3593_v62  ;;  %v3641_v62 = vld [vmem:[#allocation5 + $0x330] sm:$0xff]  }
  0x8e   :  { %3228 = vmatpush3.bf16.msra.mxu1 %v3594_v63  ;;  %3207 = vmatprep.subr.bf16.mxu0 %v3595_v0  ;;  %v3642_v63 = vld [vmem:[#allocation5 + $0x3b0] sm:$0xff]   ;;  %v3643_v0 = vld [vmem:[#allocation5 + $0x368] sm:$0xff]  }
  0x8f   :  { %3229 = vmatprep.subr.bf16.mxu1 %v3596_v1  ;;  %v3644_v1 = vld [vmem:[#allocation5 + $0x3e8] sm:$0xff]  }
  0x91   :  { %3208 = vmatpush3.bf16.msra.mxu0 %v3597_v2  ;;  %v3645_v2 = vld [vmem:[#allocation5 + $0x328] sm:$0xff]  }
  0x92   :  { %3230 = vmatpush3.bf16.msra.mxu1 %v3598_v3  ;;  %3209 = vmatprep.subr.bf16.mxu0 %v3599_v4  ;;  %v3646_v3 = vld [vmem:[#allocation5 + $0x3a8] sm:$0xff]   ;;  %v3647_v4 = vld [vmem:[#allocation5 + $0x360] sm:$0xff]  }
  0x93   :  { %3231 = vmatprep.subr.bf16.mxu1 %v3600_v5  ;;  %v3648_v5 = vld [vmem:[#allocation5 + $0x3e0] sm:$0xff]  }
  0x95   :  { %3210 = vmatpush3.bf16.msra.mxu0 %v3601_v6  ;;  %v3649_v6 = vld [vmem:[#allocation5 + $0x320] sm:$0xff]  }
  0x96   :  { %3232 = vmatpush3.bf16.msra.mxu1 %v3602_v7  ;;  %3239 = vmatprep.subr.bf16.mxu0 %v3603_v16  ;;  %v3650_v7 = vld [vmem:[#allocation5 + $0x3a0] sm:$0xff]   ;;  %v3659_v16 = vld [vmem:[#allocation5 + $0x348] sm:$0xff]  }
  0x97   :  { %3261 = vmatprep.subr.bf16.mxu1 %v3604_v17  ;;  %v3660_v17 = vld [vmem:[#allocation5 + $0x3c8] sm:$0xff]  }
  0x98   :  { %1843 = vmatmul.mubr.bf16.vlgmr.msra.gmra.mxu0 %v167_v14  ;;  %v3657_v14 = vld [vmem:[#allocation5 + $0x310] sm:$0xff]  }
  0x99   :  { %1883 = vmatmul.mubr.bf16.vlgmr.msra.gmra.mxu1 %v169_v15  ;;  %3240 = vmatpush3.bf16.msra.mxu0 %v3605_v18  ;;  %v3658_v15 = vld [vmem:[#allocation5 + $0x390] sm:$0xff]   ;;  %v3661_v18 = vld [vmem:[#allocation5 + $0x308] sm:$0xff]  }
  0x9a   :  { %3262 = vmatpush3.bf16.msra.mxu1 %v3606_v19  ;;  %3241 = vmatprep.subr.bf16.mxu0 %v3607_v20  ;;  %v3662_v19 = vld [vmem:[#allocation5 + $0x388] sm:$0xff]   ;;  %v3663_v20 = vld [vmem:[#allocation5 + $0x340] sm:$0xff]  }
  0x9b   :  { %3263 = vmatprep.subr.bf16.mxu1 %v3608_v21  ;;  %1922 = vmatprep.mubr.bf16.mxu0 %v172_v49  ;;  %v3664_v21 = vld [vmem:[#allocation5 + $0x3c0] sm:$0xff]   ;;  %v3684_v49 = vld [vmem:[#allocation5 + $0x4d8] sm:$0xff]  }
  0x9c   :  { %1962 = vmatprep.mubr.bf16.mxu1 %v174_v53  ;;  %v3688_v53 = vld [vmem:[#allocation5 + $0x4d0] sm:$0xff]  }
  0x9d   :  { %3242 = vmatpush3.bf16.msra.mxu0 %v3609_v22  ;;  %v3665_v22 = vld [vmem:[#allocation5 + $0x300] sm:$0xff]  }
  0x9e   :  { %3264 = vmatpush3.bf16.msra.mxu1 %v3610_v23  ;;  %3243 = vmatprep.subr.bf16.mxu0 %v3611_v24  ;;  %v3666_v23 = vld [vmem:[#allocation5 + $0x380] sm:$0xff]   ;;  %v152_v24 = vld [vmem:[#allocation2 + $0x68] sm:$0xff] }
  0x9f   :  { %3265 = vmatprep.subr.bf16.mxu1 %v3612_v25  ;;  %v154_v25 = vld [vmem:[#allocation2 + $0x78] sm:$0xff] }
  0xa1   :  { %3244 = vmatpush3.bf16.msra.mxu0 %v3613_v26  ;;  %v151_v26 = vld [vmem:[#allocation2 + $0x60] sm:$0xff] }
  0xa2   :  { %3266 = vmatpush3.bf16.msra.mxu1 %v3614_v27  ;;  %3245 = vmatprep.subr.bf16.mxu0 %v3615_v28  ;;  %v176_v27 = vpack.c.bf16 %v152_v24, %v152_v24  ;;  %v178_v28 = vpack.c.bf16 %v154_v25, %v154_v25  ;;  %v3715_v24 = vld [vmem:[#allocation5 + $0x558] sm:$0xff]  }
  0xa3   :  { %3267 = vmatprep.subr.bf16.mxu1 %v3616_v29  ;;  %v175_v29 = vpack.c.bf16 %v151_v26, %v151_v26  ;;  %v3716_v25 = vld [vmem:[#allocation5 + $0x5d8] sm:$0xff]  }
  0xa4   :  { %v3717_v26 = vld [vmem:[#allocation5 + $0x518] sm:$0xff]  }
  0xa5   :  { %3246 = vmatpush3.bf16.msra.mxu0 %v3617_v30  ;;  %v153_v30 = vld [vmem:[#allocation2 + $0x70] sm:$0xff] }
  0xa6   :  { %3268 = vmatpush3.bf16.msra.mxu1 %v3618_v31  ;;  %3247 = vmatprep.subr.bf16.mxu0 %v3619_v32  ;;  %v177_v31 = vpack.c.bf16 %v153_v30, %v153_v30  ;;  %v3667_v32 = vld [vmem:[#allocation5 + $0x478] sm:$0xff]   ;;  %v3721_v30 = vld [vmem:[#allocation5 + $0x510] sm:$0xff]  }
  0xa7   :  { %3269 = vmatprep.subr.bf16.mxu1 %v3620_v33  ;;  %v3668_v33 = vld [vmem:[#allocation5 + $0x4f8] sm:$0xff]  }
  0xa9   :  { %3248 = vmatpush3.bf16.msra.mxu0 %v3621_v34  ;;  %v3669_v34 = vld [vmem:[#allocation5 + $0x438] sm:$0xff]  }
  0xaa   :  { %3270 = vmatpush3.bf16.msra.mxu1 %v3622_v35  ;;  %3249 = vmatprep.subr.bf16.mxu0 %v3623_v36  ;;  %v3670_v35 = vld [vmem:[#allocation5 + $0x4b8] sm:$0xff]   ;;  %v3671_v36 = vld [vmem:[#allocation5 + $0x470] sm:$0xff]  }
  0xab   :  { %3271 = vmatprep.subr.bf16.mxu1 %v3624_v37  ;;  %v3672_v37 = vld [vmem:[#allocation5 + $0x4f0] sm:$0xff]  }
  0xad   :  { %3250 = vmatpush3.bf16.msra.mxu0 %v3625_v38  ;;  %v3673_v38 = vld [vmem:[#allocation5 + $0x430] sm:$0xff]  }
  0xae   :  { %3272 = vmatpush3.bf16.msra.mxu1 %v3626_v39  ;;  %3251 = vmatprep.subr.bf16.mxu0 %v3627_v40  ;;  %v3674_v39 = vld [vmem:[#allocation5 + $0x4b0] sm:$0xff]   ;;  %v3675_v40 = vld [vmem:[#allocation5 + $0x468] sm:$0xff]  }
  0xaf   :  { %3273 = vmatprep.subr.bf16.mxu1 %v3628_v41  ;;  %v3676_v41 = vld [vmem:[#allocation5 + $0x4e8] sm:$0xff]  }
  0xb1   :  { %3252 = vmatpush3.bf16.msra.mxu0 %v3629_v42  ;;  %v3677_v42 = vld [vmem:[#allocation5 + $0x428] sm:$0xff]  }
  0xb2   :  { %3274 = vmatpush3.bf16.msra.mxu1 %v3630_v43  ;;  %3253 = vmatprep.subr.bf16.mxu0 %v3631_v44  ;;  %v3678_v43 = vld [vmem:[#allocation5 + $0x4a8] sm:$0xff]   ;;  %v3679_v44 = vld [vmem:[#allocation5 + $0x460] sm:$0xff]  }
  0xb3   :  { %3275 = vmatprep.subr.bf16.mxu1 %v3632_v45  ;;  %v3680_v45 = vld [vmem:[#allocation5 + $0x4e0] sm:$0xff]  }
  0xb5   :  { %3254 = vmatpush3.bf16.msra.mxu0 %v3633_v46  ;;  %v3681_v46 = vld [vmem:[#allocation5 + $0x420] sm:$0xff]  }
  0xb6   :  { %3276 = vmatpush3.bf16.msra.mxu1 %v3634_v47  ;;  %3283 = vmatprep.subr.bf16.mxu0 %v3635_v56  ;;  %v3682_v47 = vld [vmem:[#allocation5 + $0x4a0] sm:$0xff]   ;;  %v3691_v56 = vld [vmem:[#allocation5 + $0x448] sm:$0xff]  }
  0xb7   :  { %3305 = vmatprep.subr.bf16.mxu1 %v3636_v57  ;;  %v3692_v57 = vld [vmem:[#allocation5 + $0x4c8] sm:$0xff]  }
  0xb8   :  { %1923 = vmatmul.mubr.bf16.vlgmr.msra.gmra.mxu0 %v171_v54  ;;  %v3689_v54 = vld [vmem:[#allocation5 + $0x410] sm:$0xff]  }
  0xb9   :  { %1963 = vmatmul.mubr.bf16.vlgmr.msra.gmra.mxu1 %v173_v55  ;;  %3284 = vmatpush3.bf16.msra.mxu0 %v3637_v58  ;;  %v3690_v55 = vld [vmem:[#allocation5 + $0x490] sm:$0xff]   ;;  %v3693_v58 = vld [vmem:[#allocation5 + $0x408] sm:$0xff]  }
  0xba   :  { %3306 = vmatpush3.bf16.msra.mxu1 %v3638_v59  ;;  %3285 = vmatprep.subr.bf16.mxu0 %v3639_v60  ;;  %v3694_v59 = vld [vmem:[#allocation5 + $0x488] sm:$0xff]   ;;  %v3695_v60 = vld [vmem:[#allocation5 + $0x440] sm:$0xff]  }
  0xbb   :  { %3307 = vmatprep.subr.bf16.mxu1 %v3640_v61  ;;  %2002 = vmatprep.mubr.bf16.mxu0 %v176_v27  ;;  %v3696_v61 = vld [vmem:[#allocation5 + $0x4c0] sm:$0xff]   ;;  %v3718_v27 = vld [vmem:[#allocation5 + $0x598] sm:$0xff]  }
  0xbc   :  { %2042 = vmatprep.mubr.bf16.mxu1 %v178_v28  ;;  %v3719_v28 = vld [vmem:[#allocation5 + $0x550] sm:$0xff]  }
  0xbd   :  { %3286 = vmatpush3.bf16.msra.mxu0 %v3641_v62  ;;  %v3697_v62 = vld [vmem:[#allocation5 + $0x400] sm:$0xff]  }
  0xbe   :  { %3308 = vmatpush3.bf16.msra.mxu1 %v3642_v63  ;;  %3287 = vmatprep.subr.bf16.mxu0 %v3643_v0  ;;  %v3698_v63 = vld [vmem:[#allocation5 + $0x480] sm:$0xff]   ;;  %v156_v0 = vld [vmem:[#allocation2 + $0x88] sm:$0xff] }
  0xbf   :  { %3309 = vmatprep.subr.bf16.mxu1 %v3644_v1  ;;  %v158_v1 = vld [vmem:[#allocation2 + $0x98] sm:$0xff] }
  0xc1   :  { %3288 = vmatpush3.bf16.msra.mxu0 %v3645_v2  ;;  %v180_v2 = vpack.c.bf16 %v156_v0, %v156_v0  ;;  %v3733_v0 = vld [vmem:[#allocation7 + $0x28] sm:$0xff]  }
  0xc2   :  { %3310 = vmatpush3.bf16.msra.mxu1 %v3646_v3  ;;  %3289 = vmatprep.subr.bf16.mxu0 %v3647_v4  ;;  %v182_v3 = vpack.c.bf16 %v158_v1, %v158_v1  ;;  %v155_v4 = vld [vmem:[#allocation2 + $0x80] sm:$0xff] }
  0xc3   :  { %3311 = vmatprep.subr.bf16.mxu1 %v3648_v5  ;;  %v157_v5 = vld [vmem:[#allocation2 + $0x90] sm:$0xff]  ;;  %v3734_v1 = vld [vmem:[#allocation7 + $0x20] sm:$0xff]  }
  0xc5   :  { %3290 = vmatpush3.bf16.msra.mxu0 %v3649_v6  ;;  %v179_v6 = vpack.c.bf16 %v155_v4, %v155_v4 }
  0xc6   :  { %3312 = vmatpush3.bf16.msra.mxu1 %v3650_v7  ;;  %3291 = vmatprep.subr.bf16.mxu0 %v3651_v8  ;;  %v181_v7 = vpack.c.bf16 %v157_v5, %v157_v5  ;;  %v3699_v8 = vld [vmem:[#allocation5 + $0x578] sm:$0xff]  }
  0xc7   :  { %3313 = vmatprep.subr.bf16.mxu1 %v3652_v9  ;;  %v3700_v9 = vld [vmem:[#allocation5 + $0x5f8] sm:$0xff]  }
  0xc9   :  { %3292 = vmatpush3.bf16.msra.mxu0 %v3653_v10  ;;  %v3701_v10 = vld [vmem:[#allocation5 + $0x538] sm:$0xff]  }
  0xca   :  { %3314 = vmatpush3.bf16.msra.mxu1 %v3654_v11  ;;  %3293 = vmatprep.subr.bf16.mxu0 %v3655_v12  ;;  %v3702_v11 = vld [vmem:[#allocation5 + $0x5b8] sm:$0xff]   ;;  %v3703_v12 = vld [vmem:[#allocation5 + $0x570] sm:$0xff]  }
  0xcb   :  { %3315 = vmatprep.subr.bf16.mxu1 %v3656_v13  ;;  %v3704_v13 = vld [vmem:[#allocation5 + $0x5f0] sm:$0xff]  }
  0xcd   :  { %3294 = vmatpush3.bf16.msra.mxu0 %v3657_v14  ;;  %v3705_v14 = vld [vmem:[#allocation5 + $0x530] sm:$0xff]  }
  0xce   :  { %3316 = vmatpush3.bf16.msra.mxu1 %v3658_v15  ;;  %3295 = vmatprep.subr.bf16.mxu0 %v3659_v16  ;;  %v3706_v15 = vld [vmem:[#allocation5 + $0x5b0] sm:$0xff]   ;;  %v3707_v16 = vld [vmem:[#allocation5 + $0x568] sm:$0xff]  }
  0xcf   :  { %3317 = vmatprep.subr.bf16.mxu1 %v3660_v17  ;;  %v3708_v17 = vld [vmem:[#allocation5 + $0x5e8] sm:$0xff]  }
  0xd1   :  { %3296 = vmatpush3.bf16.msra.mxu0 %v3661_v18  ;;  %v3709_v18 = vld [vmem:[#allocation5 + $0x528] sm:$0xff]  }
  0xd2   :  { %3318 = vmatpush3.bf16.msra.mxu1 %v3662_v19  ;;  %3297 = vmatprep.subr.bf16.mxu0 %v3663_v20  ;;  %v3710_v19 = vld [vmem:[#allocation5 + $0x5a8] sm:$0xff]   ;;  %v3711_v20 = vld [vmem:[#allocation5 + $0x560] sm:$0xff]  }
  0xd3   :  { %3319 = vmatprep.subr.bf16.mxu1 %v3664_v21  ;;  %v3712_v21 = vld [vmem:[#allocation5 + $0x5e0] sm:$0xff]  }
  0xd5   :  { %3298 = vmatpush3.bf16.msra.mxu0 %v3665_v22  ;;  %v3713_v22 = vld [vmem:[#allocation5 + $0x520] sm:$0xff]  }
  0xd6   :  { %3320 = vmatpush3.bf16.msra.mxu1 %v3666_v23  ;;  %3327 = vmatprep.subr.bf16.mxu0 %v3667_v32  ;;  %v3714_v23 = vld [vmem:[#allocation5 + $0x5a0] sm:$0xff]   ;;  %v3723_v32 = vld [vmem:[#allocation5 + $0x548] sm:$0xff]  }
  0xd7   :  { %3349 = vmatprep.subr.bf16.mxu1 %v3668_v33  ;;  %v3724_v33 = vld [vmem:[#allocation5 + $0x5c8] sm:$0xff]  }
  0xd8   :  { %2003 = vmatmul.mubr.bf16.vlgmr.msra.gmra.mxu0 %v175_v29  ;;  %v3720_v29 = vld [vmem:[#allocation5 + $0x5d0] sm:$0xff]  }
  0xd9   :  { %2043 = vmatmul.mubr.bf16.vlgmr.msra.gmra.mxu1 %v177_v31  ;;  %3328 = vmatpush3.bf16.msra.mxu0 %v3669_v34  ;;  %v3722_v31 = vld [vmem:[#allocation5 + $0x590] sm:$0xff]   ;;  %v3725_v34 = vld [vmem:[#allocation5 + $0x508] sm:$0xff]  }
  0xda   :  { %3350 = vmatpush3.bf16.msra.mxu1 %v3670_v35  ;;  %3329 = vmatprep.subr.bf16.mxu0 %v3671_v36  ;;  %v3726_v35 = vld [vmem:[#allocation5 + $0x588] sm:$0xff]   ;;  %v3727_v36 = vld [vmem:[#allocation5 + $0x540] sm:$0xff]  }
  0xdb   :  { %3351 = vmatprep.subr.bf16.mxu1 %v3672_v37  ;;  %2082 = vmatprep.mubr.bf16.mxu0 %v180_v2  ;;  %v3728_v37 = vld [vmem:[#allocation5 + $0x5c0] sm:$0xff]   ;;  %v3735_v2 = vld [vmem:[#allocation7 + $0x18] sm:$0xff]  }
  0xdc   :  { %2122 = vmatprep.mubr.bf16.mxu1 %v182_v3 }
  0xdd   :  { %3330 = vmatpush3.bf16.msra.mxu0 %v3673_v38  ;;  %v3729_v38 = vld [vmem:[#allocation5 + $0x500] sm:$0xff]  }
  0xde   :  { %3352 = vmatpush3.bf16.msra.mxu1 %v3674_v39  ;;  %3331 = vmatprep.subr.bf16.mxu0 %v3675_v40  ;;  %v3730_v39 = vld [vmem:[#allocation5 + $0x580] sm:$0xff]   ;;  %v160_v40 = vld [vmem:[#allocation2 + $0xa8] sm:$0xff] }
  0xdf   :  { %3353 = vmatprep.subr.bf16.mxu1 %v3676_v41  ;;  %v184_v41 = vpack.c.bf16 %v160_v40, %v160_v40 }
  0xe1   :  { %3332 = vmatpush3.bf16.msra.mxu0 %v3677_v42  ;;  %v162_v42 = vld [vmem:[#allocation2 + $0xb8] sm:$0xff] }
  0xe2   :  { %3354 = vmatpush3.bf16.msra.mxu1 %v3678_v43  ;;  %3333 = vmatprep.subr.bf16.mxu0 %v3679_v44  ;;  %v159_v43 = vld [vmem:[#allocation2 + $0xa0] sm:$0xff]  ;;  %v161_v44 = vld [vmem:[#allocation2 + $0xb0] sm:$0xff] }
  0xe3   :  { %3355 = vmatprep.subr.bf16.mxu1 %v3680_v45  ;;  %v186_v45 = vpack.c.bf16 %v162_v42, %v162_v42 }
  0xe5   :  { %3334 = vmatpush3.bf16.msra.mxu0 %v3681_v46  ;;  %v183_v46 = vpack.c.bf16 %v159_v43, %v159_v43  ;;  %v3757_v43 = vld [vmem:[#allocation8 + $0x10] ss:$8 sps:$4 sm:$0xff]  }
  0xe6   :  { %3356 = vmatpush3.bf16.msra.mxu1 %v3682_v47  ;;  %3335 = vmatprep.subr.bf16.mxu0 %v3683_v48  ;;  %v185_v47 = vpack.c.bf16 %v161_v44, %v161_v44 }
  0xe7   :  { %3357 = vmatprep.subr.bf16.mxu1 %v3684_v49 }
  0xe9   :  { %3336 = vmatpush3.bf16.msra.mxu0 %v3685_v50  ;;  %v2898_v50 = vld [vmem:[%s4139_s2] ss:$0 sm:$0xff] }
  0xea   :  { %3358 = vmatpush3.bf16.msra.mxu1 %v3686_v51  ;;  %3337 = vmatprep.subr.bf16.mxu0 %v3687_v52 }
  0xeb   :  { %3359 = vmatprep.subr.bf16.mxu1 %v3688_v53 }
  0xed   :  { %3338 = vmatpush3.bf16.msra.mxu0 %v3689_v54 }
  0xee   :  { %3360 = vmatpush3.bf16.msra.mxu1 %v3690_v55  ;;  %3339 = vmatprep.subr.bf16.mxu0 %v3691_v56 }
  0xef   :  { %3361 = vmatprep.subr.bf16.mxu1 %v3692_v57 }
  0xf1   :  { %3340 = vmatpush3.bf16.msra.mxu0 %v3693_v58 }
  0xf2   :  { %3362 = vmatpush3.bf16.msra.mxu1 %v3694_v59  ;;  %3341 = vmatprep.subr.bf16.mxu0 %v3695_v60 }
  0xf3   :  { %3363 = vmatprep.subr.bf16.mxu1 %v3696_v61  ;;  %v3731_v61 = vld [vmem:[#allocation7 + $0x38] sm:$0xff]  }
  0xf5   :  { %3342 = vmatpush3.bf16.msra.mxu0 %v3697_v62  ;;  %v3976_v62 = vmov 0.0  }
  0xf6   :  { %3364 = vmatpush3.bf16.msra.mxu1 %v3698_v63  ;;  %3371 = vmatprep.subr.bf16.mxu0 %v3699_v8  ;;  %v3732_v63 = vld [vmem:[#allocation7 + $0x30] sm:$0xff]  }
  0xf7   :  { %3393 = vmatprep.subr.bf16.mxu1 %v3700_v9 }
  0xf8   :  { %2083 = vmatmul.mubr.bf16.vlgmr.msra.gmra.mxu0 %v179_v6 }
  0xf9   :  { %2123 = vmatmul.mubr.bf16.vlgmr.msra.gmra.mxu1 %v181_v7  ;;  %3372 = vmatpush3.bf16.msra.mxu0 %v3701_v10 }
  0xfa   :  { %3394 = vmatpush3.bf16.msra.mxu1 %v3702_v11  ;;  %3373 = vmatprep.subr.bf16.mxu0 %v3703_v12 }
  0xfb   :  { %3395 = vmatprep.subr.bf16.mxu1 %v3704_v13  ;;  %2162 = vmatprep.mubr.bf16.mxu0 %v184_v41  ;;  %v3736_v13 = vld [vmem:[#allocation7 + $0x10] sm:$0xff]  }
  0xfc   :  { %2202 = vmatprep.mubr.bf16.mxu1 %v186_v45 }
  0xfd   :  { %3374 = vmatpush3.bf16.msra.mxu0 %v3705_v14 }
  0xfe   :  { %3396 = vmatpush3.bf16.msra.mxu1 %v3706_v15  ;;  %3375 = vmatprep.subr.bf16.mxu0 %v3707_v16  ;;  %v3737_v16 = vld [vmem:[#allocation7 + $0x8] sm:$0xff]  }
  0xff   :  { %3397 = vmatprep.subr.bf16.mxu1 %v3708_v17  ;;  %v3738_v17 = vld [vmem:[#allocation7] sm:$0xff]  }
 0x101   :  { %3376 = vmatpush3.bf16.msra.mxu0 %v3709_v18  ;;  %v3739_v18 = vld [vmem:[#allocation8 + $0x70] ss:$8 sps:$4 sm:$0xff]  }
 0x102   :  { %3398 = vmatpush3.bf16.msra.mxu1 %v3710_v19  ;;  %3377 = vmatprep.subr.bf16.mxu0 %v3711_v20  ;;  %v3741_v19 = vld [vmem:[#allocation8 + $0x74] ss:$8 sps:$4 sm:$0xff]   ;;  %v3744_v20 = vld [vmem:[#allocation8 + $0x64] ss:$8 sps:$4 sm:$0xff]  }
 0x103   :  { %3399 = vmatprep.subr.bf16.mxu1 %v3712_v21  ;;  %v3742_v21 = vld [vmem:[#allocation8 + $0x60] ss:$8 sps:$4 sm:$0xff]  }
 0x105   :  { %3378 = vmatpush3.bf16.msra.mxu0 %v3713_v22  ;;  %v3747_v22 = vld [vmem:[#allocation8 + $0x54] ss:$8 sps:$4 sm:$0xff]  }
 0x106   :  { %3400 = vmatpush3.bf16.msra.mxu1 %v3714_v23  ;;  %3379 = vmatprep.subr.bf16.mxu0 %v3715_v24  ;;  %v3745_v23 = vld [vmem:[#allocation8 + $0x50] ss:$8 sps:$4 sm:$0xff]   ;;  %v3750_v24 = vld [vmem:[#allocation8 + $0x44] ss:$8 sps:$4 sm:$0xff]  }
 0x107   :  { %3401 = vmatprep.subr.bf16.mxu1 %v3716_v25  ;;  %v3748_v25 = vld [vmem:[#allocation8 + $0x40] ss:$8 sps:$4 sm:$0xff]  }
 0x109   :  { %3380 = vmatpush3.bf16.msra.mxu0 %v3717_v26  ;;  %v3753_v26 = vld [vmem:[#allocation8 + $0x34] ss:$8 sps:$4 sm:$0xff]  }
 0x10a   :  { %3402 = vmatpush3.bf16.msra.mxu1 %v3718_v27  ;;  %3381 = vmatprep.subr.bf16.mxu0 %v3719_v28  ;;  %v3751_v28 = vld [vmem:[#allocation8 + $0x30] ss:$8 sps:$4 sm:$0xff]  }
 0x10b   :  { %3403 = vmatprep.subr.bf16.mxu1 %v3720_v29 }
 0x10d   :  { %3382 = vmatpush3.bf16.msra.mxu0 %v3721_v30  ;;  %v3756_v30 = vld [vmem:[#allocation8 + $0x24] ss:$8 sps:$4 sm:$0xff]  }
 0x10e   :  { %3404 = vmatpush3.bf16.msra.mxu1 %v3722_v31  ;;  %3383 = vmatprep.subr.bf16.mxu0 %v3723_v32 }
 0x10f   :  { %3405 = vmatprep.subr.bf16.mxu1 %v3724_v33 }
 0x111   :  { %3384 = vmatpush3.bf16.msra.mxu0 %v3725_v34 }
 0x112   :  { %3406 = vmatpush3.bf16.msra.mxu1 %v3726_v35  ;;  %3385 = vmatprep.subr.bf16.mxu0 %v3727_v36  ;;  %v3754_v36 = vld [vmem:[#allocation8 + $0x20] ss:$8 sps:$4 sm:$0xff]  }
 0x113   :  { %3407 = vmatprep.subr.bf16.mxu1 %v3728_v37 }
 0x115   :  { %3386 = vmatpush3.bf16.msra.mxu0 %v3729_v38 }
 0x116   :  { %3408 = vmatpush3.bf16.msra.mxu1 %v3730_v39  ;;  %3464 = vmatprep.subr.bf16.mxu0 %v3976_v62  ;;  %v3759_v39 = vld [vmem:[#allocation8 + $0x14] ss:$8 sps:$4 sm:$0xff]  }
 0x117   :  { %2433 = vmatprep.subr.bf16.mxu1 %v3741_v19  ;;  %v3762_v19 = vld [vmem:[#allocation8 + $0x4] ss:$8 sps:$4 sm:$0xff]  }
 0x118   :  { %2163 = vmatmul.mubr.bf16.vlgmr.msra.gmra.mxu0 %v183_v46 }
 0x119   :  { %2203 = vmatmul.mubr.bf16.vlgmr.msra.gmra.mxu1 %v185_v47  ;;  %3465 = vmatpush3.bf16.msra.mxu0 %v3731_v61 }
 0x11a   :  { %3466 = vmatprep.subr.bf16.mxu0 %v3976_v62  ;;  %3480 = vmatprep.mubr.msk.bf16.mxu0 %vm3977_vm0, %v3976_v62 }
 0x11b   :  { %2434 = vmatpush1.bf16.msra.mxu1 %v3739_v18 }
 0x11c   :  { %2435 = vmatprep.subr.bf16.mxu1 %v3744_v20  ;;  %v3760_v20 = vld [vmem:[#allocation8] ss:$8 sps:$4 sm:$0xff]  }
 0x11d   :  { %3467 = vmatpush3.bf16.msra.mxu0 %v3732_v63 }
 0x11e   :  { %3468 = vmatprep.subr.bf16.mxu0 %v3976_v62 }
 0x11f   :  { %2436 = vmatpush1.bf16.msra.mxu1 %v3742_v21  ;;  %v3978_v21 = vmov 0  }
 0x120   :  { %2437 = vmatprep.subr.bf16.mxu1 %v3747_v22  ;;  %2465 = vmatprep.mubr.bf16.mxu1 %v3978_v21  ;;  %v3763_v22 = vld [vmem:[#allocation10 + $0x78] sm:$0xff]  }
 0x121   :  { %3469 = vmatpush3.bf16.msra.mxu0 %v3733_v0 }
 0x122   :  { %3470 = vmatprep.subr.bf16.mxu0 %v3976_v62 }
 0x123   :  { %2438 = vmatpush1.bf16.msra.mxu1 %v3745_v23  ;;  %v3764_v23 = vld [vmem:[#allocation10 + $0x38] sm:$0xff]  }
 0x124   :  { %2439 = vmatprep.subr.bf16.mxu1 %v3750_v24  ;;  %v3765_v24 = vld [vmem:[#allocation10 + $0x70] sm:$0xff]  }
 0x125   :  { %3471 = vmatpush3.bf16.msra.mxu0 %v3734_v1 }
 0x126   :  { %3472 = vmatprep.subr.bf16.mxu0 %v3976_v62 }
 0x127   :  { %2440 = vmatpush1.bf16.msra.mxu1 %v3748_v25  ;;  %v3766_v25 = vld [vmem:[#allocation10 + $0x30] sm:$0xff]  }
 0x128   :  { %2441 = vmatprep.subr.bf16.mxu1 %v3753_v26  ;;  %v3767_v26 = vld [vmem:[#allocation10 + $0x68] sm:$0xff]  }
 0x129   :  { %3473 = vmatpush3.bf16.msra.mxu0 %v3735_v2 }
 0x12a   :  { %3474 = vmatprep.subr.bf16.mxu0 %v3976_v62 }
 0x12b   :  { %2442 = vmatpush1.bf16.msra.mxu1 %v3751_v28  ;;  %v3769_v28 = vld [vmem:[#allocation10 + $0x60] sm:$0xff]  }
 0x12c   :  { %2443 = vmatprep.subr.bf16.mxu1 %v3756_v30  ;;  %v3771_v30 = vld [vmem:[#allocation10 + $0x58] sm:$0xff]  }
 0x12d   :  { %3475 = vmatpush3.bf16.msra.mxu0 %v3736_v13 }
 0x12e   :  { %3476 = vmatprep.subr.bf16.mxu0 %v3976_v62 }
 0x12f   :  { %2444 = vmatpush1.bf16.msra.mxu1 %v3754_v36 }
 0x130   :  { %2445 = vmatprep.subr.bf16.mxu1 %v3759_v39 }
 0x131   :  { %3477 = vmatpush3.bf16.msra.mxu0 %v3737_v16 }
 0x132   :  { %3478 = vmatprep.subr.bf16.mxu0 %v3976_v62 }
 0x133   :  { %2446 = vmatpush1.bf16.msra.mxu1 %v3757_v43  ;;  %v3776_v43 = vld [vmem:[#allocation10 + $0x8] sm:$0xff]  }
 0x134   :  { %2447 = vmatprep.subr.bf16.mxu1 %v3762_v19 }
 0x135   :  { %3479 = vmatpush3.bf16.msra.mxu0 %v3738_v17 }
 0x136   :  { %3424 = vmatprep.subr.bf16.mxu0 %v3763_v22 }
 0x137   :  { %2448 = vmatpush1.bf16.msra.mxu1 %v3760_v20 }
 0x138   :  { %v3167_v48 = vpop.f32.mrf.mxu0  ;;  %3484 = vmatprep.subr.bf16.mxu1 %v3976_v62 }
 0x139   :  { %v3189_v49 = vpop.f32.mrf.mxu1 }
 0x13a   :  { %v3168_v51 = vpop.f32.mrf.mxu0 }
 0x13b   :  { %v3190_v52 = vpop.f32.mrf.mxu1  ;;  %v3169_v53 = vadd.f32 %v3168_v51, %v3167_v48 }
 0x13c   :  { %v3191_v54 = vadd.f32 %v3190_v52, %v3189_v49  ;;  %v3170_v55 = vpop.f32.mrf.mxu0 }
 0x13d   :  { %v3192_v56 = vpop.f32.mrf.mxu1  ;;  %v1765_v57 = vadd.f32 %v3169_v53, %v2898_v50 }
 0x13e   :  { %v3171_v58 = vpop.f32.mrf.mxu0 }
 0x13f   :  { %v3193_v59 = vpop.f32.mrf.mxu1  ;;  %v1805_v60 = vadd.f32 %v3191_v54, %v1765_v57 }
 0x158   :  { %v3211_v3 = vpop.f32.mrf.mxu0 }
 0x159   :  { %v3233_v4 = vpop.f32.mrf.mxu1 }
 0x15a   :  { %v3212_v5 = vpop.f32.mrf.mxu0 }
 0x15b   :  { %v3213_v6 = vadd.f32 %v3212_v5, %v3211_v3  ;;  %v3234_v7 = vpop.f32.mrf.mxu1 }
 0x15c   :  { %v3235_v8 = vadd.f32 %v3234_v7, %v3233_v4  ;;  %v3214_v9 = vpop.f32.mrf.mxu0 }
 0x15d   :  { %v1845_v10 = vadd.f32 %v3213_v6, %v1805_v60  ;;  %v3236_v11 = vpop.f32.mrf.mxu1 }
 0x15e   :  { %v3215_v12 = vpop.f32.mrf.mxu0 }
 0x15f   :  { %v1885_v14 = vadd.f32 %v3235_v8, %v1845_v10  ;;  %v3237_v15 = vpop.f32.mrf.mxu1 }
 0x178   :  { %v3255_v27 = vpop.f32.mrf.mxu0 }
 0x179   :  { %v3277_v29 = vpop.f32.mrf.mxu1 }
 0x17a   :  { %v3256_v31 = vpop.f32.mrf.mxu0 }
 0x17b   :  { %v3257_v32 = vadd.f32 %v3256_v31, %v3255_v27  ;;  %v3278_v33 = vpop.f32.mrf.mxu1  ;;  %v3768_v27 = vld [vmem:[#allocation10 + $0x28] sm:$0xff]   ;;  %v3772_v31 = vld [vmem:[#allocation10 + $0x18] sm:$0xff]  }
 0x17c   :  { %v3279_v34 = vadd.f32 %v3278_v33, %v3277_v29  ;;  %v3258_v35 = vpop.f32.mrf.mxu0  ;;  %v3770_v29 = vld [vmem:[#allocation10 + $0x20] sm:$0xff]   ;;  %v3774_v33 = vld [vmem:[#allocation10 + $0x10] sm:$0xff]  }
 0x17d   :  { %v1925_v37 = vadd.f32 %v3257_v32, %v1885_v14  ;;  %v3280_v38 = vpop.f32.mrf.mxu1  ;;  %v3773_v32 = vld [vmem:[#allocation10 + $0x50] sm:$0xff]  }
 0x17e   :  { %v3259_v40 = vpop.f32.mrf.mxu0 }
 0x17f   :  { %v1965_v41 = vadd.f32 %v3279_v34, %v1925_v37  ;;  %v3281_v42 = vpop.f32.mrf.mxu1  ;;  %v3091_v34 = vld [vmem:[%s4141_s4] ss:$0 sm:$0xff] }
 0x180   :  { %v3775_v42 = vld [vmem:[#allocation10 + $0x48] sm:$0xff]  }
 0x198   :  { %v3299_v44 = vpop.f32.mrf.mxu0 }
 0x199   :  { %v3321_v45 = vpop.f32.mrf.mxu1 }
 0x19a   :  { %v3300_v46 = vpop.f32.mrf.mxu0 }
 0x19b   :  { %v3322_v47 = vpop.f32.mrf.mxu1  ;;  %v3301_v60 = vadd.f32 %v3300_v46, %v3299_v44  ;;  %v3777_v44 = vld [vmem:[#allocation10 + $0x40] sm:$0xff]   ;;  %v3779_v46 = vld [vmem:[#allocation11 + $0x38] sm:$0xff]  }
 0x19c   :  { %v3302_v48 = vpop.f32.mrf.mxu0  ;;  %v3323_v63 = vadd.f32 %v3322_v47, %v3321_v45  ;;  %v3778_v45 = vld [vmem:[#allocation10] sm:$0xff]   ;;  %v3780_v47 = vld [vmem:[#allocation11 + $0x30] sm:$0xff]  }
 0x19d   :  { %v3324_v49 = vpop.f32.mrf.mxu1  ;;  %v2005_v61 = vadd.f32 %v3301_v60, %v1965_v41  ;;  %v3781_v48 = vld [vmem:[#allocation11 + $0x28] sm:$0xff]  }
 0x19e   :  { %v3303_v50 = vpop.f32.mrf.mxu0  ;;  %v3782_v49 = vld [vmem:[#allocation11 + $0x20] sm:$0xff]  }
 0x19f   :  { %v3325_v51 = vpop.f32.mrf.mxu1  ;;  %v2045_v1 = vadd.f32 %v3323_v63, %v2005_v61  ;;  %v3783_v50 = vld [vmem:[#allocation11 + $0x18] sm:$0xff]  }
 0x1a0   :  { %v2343_v51 = vlaneseq }
 0x1b8   :  { %v3343_v52 = vpop.f32.mrf.mxu0 }
 0x1b9   :  { %v3365_v53 = vpop.f32.mrf.mxu1 }
 0x1ba   :  { %v3344_v54 = vpop.f32.mrf.mxu0 }
 0x1bb   :  { %v3366_v55 = vpop.f32.mrf.mxu1  ;;  %v3345_v0 = vadd.f32 %v3344_v54, %v3343_v52  ;;  %v2344_v52 = vshrl.u32 %v2343_v51, 7  ;;  %v2341_v54 = vld [vmem:[%s4143_s6] sm:$0x3] }
 0x1bc   :  { %v3346_v56 = vpop.f32.mrf.mxu0  ;;  %v3367_v3 = vadd.f32 %v3366_v55, %v3365_v53 }
 0x1bd   :  { %v3368_v57 = vpop.f32.mrf.mxu1  ;;  %v2085_v2 = vadd.f32 %v3345_v0, %v2045_v1  ;;  %v2345_v53 = vsub.s32 0, %v2344_v52  ;;  %v2349_v55 = vsub.s32 1, %v2344_v52 }
 0x1be   :  { %v3347_v58 = vpop.f32.mrf.mxu0 }
 0x1bf   :  { %v3369_v59 = vpop.f32.mrf.mxu1  ;;  %v2125_v7 = vadd.f32 %v3367_v3, %v2085_v2  ;;  %v2346_v56 = vrot.slane %v2341_v54, %v2345_v53  ;;  %v2350_v57 = vrot.slane %v2341_v54, %v2349_v55 }
 0x1d8   :  { %v3387_v4 = vpop.f32.mrf.mxu0 }
 0x1d9   :  { %v3409_v5 = vpop.f32.mrf.mxu1 }
 0x1da   :  { %v3388_v6 = vpop.f32.mrf.mxu0 }
 0x1db   :  { %v3389_v8 = vadd.f32 %v3388_v6, %v3387_v4  ;;  %v3410_v9 = vpop.f32.mrf.mxu1  ;;  %v3785_v6 = vld [vmem:[#allocation11 + $0x8] sm:$0xff]  }
 0x1dc   :  { %v3390_v10 = vpop.f32.mrf.mxu0  ;;  %v3411_v12 = vadd.f32 %v3410_v9, %v3409_v5  ;;  %v3784_v5 = vld [vmem:[#allocation11 + $0x10] sm:$0xff]  }
 0x1dd   :  { %v2165_v11 = vadd.f32 %v3389_v8, %v2125_v7  ;;  %v3412_v13 = vpop.f32.mrf.mxu1  ;;  %v3786_v7 = vld [vmem:[#allocation11] sm:$0xff]   ;;  %v3787_v8 = vld [vmem:[#allocation13 + $0x38] sm:$0xff]   ;;  %v3788_v9 = vld [vmem:[#allocation13 + $0x30] sm:$0xff]  }
 0x1de   :  { %v3391_v14 = vpop.f32.mrf.mxu0  ;;  %v3789_v10 = vld [vmem:[#allocation13 + $0x28] sm:$0xff]   ;;  %v3792_v13 = vld [vmem:[#allocation13 + $0x10] sm:$0xff]  }
 0x1df   :  { %v2205_v15 = vadd.f32 %v3411_v12, %v2165_v11  ;;  %v3413_v16 = vpop.f32.mrf.mxu1  ;;  %v3790_v11 = vld [vmem:[#allocation13 + $0x20] sm:$0xff]   ;;  %v3791_v12 = vld [vmem:[#allocation13 + $0x18] sm:$0xff]  }
 0x1e1   :  { %v2210_v17 = vmax.f32 %v2205_v15, 0.0  ;;  %v3116_v15 = vld [vmem:[%s4145_s8] ss:$0 sm:$0xff] }
 0x1e3   :  { %v2211_v18 = vpack.c.bf16 %v2210_v17, %v2210_v17 }
 0x1e5   :  { %3481 = vmatmul.mubr.bf16.vlgmr.msra.gmra.mxu0 %v2211_v18 }
 0x1e6   :  { %3425 = vmatpush3.bf16.msra.mxu0 %v3764_v23  ;;  %v3793_v23 = vld [vmem:[#allocation13 + $0x8] sm:$0xff]  }
 0x1e7   :  { %3426 = vmatprep.subr.bf16.mxu0 %v3765_v24  ;;  %v3794_v24 = vld [vmem:[#allocation13] sm:$0xff]  }
 0x1ea   :  { %3427 = vmatpush3.bf16.msra.mxu0 %v3766_v25  ;;  %v3133_v25 = vld [vmem:[%s4147_s10] ss:$0 sm:$0xff]  ;;  %s3935_s10 = scalar_lea.vmem %s2887_s15, 128 }
 0x1eb   :  { %3428 = vmatprep.subr.bf16.mxu0 %v3767_v26  ;;  %p3936_p7 = scmp.ne.s32.totalorder %s2887_s15, %s3935_s10  ;;  %p3941_p9 = scmp.lt.s32.totalorder %s3935_s10, %s3935_s10 }
 0x1ed   :  { %p3942_p10 = por %p3941_p9, %p3940_p8 }
 0x1ee   :  { %3429 = vmatpush3.bf16.msra.mxu0 %v3768_v27 }
 0x1ef   :  { %3430 = vmatprep.subr.bf16.mxu0 %v3769_v28  ;;  %p3943_p11 = pnand %p3942_p10, %p3936_p7 }
 0x1f2   :  { %3431 = vmatpush3.bf16.msra.mxu0 %v3770_v29 }
 0x1f3   :  { %3432 = vmatprep.subr.bf16.mxu0 %v3771_v30 }
 0x1f6   :  { %3433 = vmatpush3.bf16.msra.mxu0 %v3772_v31 }
 0x1f7   :  { %3434 = vmatprep.subr.bf16.mxu0 %v3773_v32 }
 0x1fa   :  { %3435 = vmatpush3.bf16.msra.mxu0 %v3774_v33  ;;  %v3142_v33 = vld [vmem:[%s4149_s12] ss:$0 sm:$0xff] }
 0x1fb   :  { %3436 = vmatprep.subr.bf16.mxu0 %v3775_v42 }
 0x1fe   :  { %3437 = vmatpush3.bf16.msra.mxu0 %v3776_v43 }
 0x1ff   :  { %3438 = vmatprep.subr.bf16.mxu0 %v3777_v44 }
 0x202   :  { %3439 = vmatpush3.bf16.msra.mxu0 %v3778_v45 }
 0x203   :  { %3504 = vmatprep.subr.bf16.mxu0 %v3976_v62 }
 0x2a5   :  { %v2317_v35 = vpop.f32.mrf.mxu0 }
 0x2a6   :  { %v2318_v36 = vadd.f32 %v3091_v34, %v2317_v35 }
 0x2a7   :  { %v3482_v37 = vpop.f32.mrf.mxu0 }
 0x2a8   :  { %v2323_v38 = vmax.f32 %v2318_v36, 0.0 }
 0x2a9   :  { %v2320_v39 = vpop.f32.mrf.mxu0 }
 0x2aa   :  { %v2324_v40 = vpack.c.bf16 %v2323_v38, %v2323_v38 }
 0x2ab   :  { %v3483_v41 = vpop.f32.mrf.mxu0 }
 0x2ac   :  { %2466 = vmatmul.mubr.bf16.vlgmr.msra.gmra.mxu1 %v2324_v40 }
 0x2ad   :  { %3500 = vmatprep.mubr.msk.bf16.mxu1 %vm3977_vm0, %v3976_v62  ;;  %3485 = vmatpush3.bf16.msra.mxu1 %v3779_v46 }
 0x2ae   :  { %3486 = vmatprep.subr.bf16.mxu1 %v3976_v62 }
 0x2b1   :  { %3487 = vmatpush3.bf16.msra.mxu1 %v3780_v47 }
 0x2b2   :  { %3488 = vmatprep.subr.bf16.mxu1 %v3976_v62 }
 0x2b5   :  { %3489 = vmatpush3.bf16.msra.mxu1 %v3781_v48 }
 0x2b6   :  { %3490 = vmatprep.subr.bf16.mxu1 %v3976_v62 }
 0x2b9   :  { %3491 = vmatpush3.bf16.msra.mxu1 %v3782_v49 }
 0x2ba   :  { %3492 = vmatprep.subr.bf16.mxu1 %v3976_v62 }
 0x2bd   :  { %3493 = vmatpush3.bf16.msra.mxu1 %v3783_v50 }
 0x2be   :  { %3494 = vmatprep.subr.bf16.mxu1 %v3976_v62 }
 0x2c1   :  { %3495 = vmatpush3.bf16.msra.mxu1 %v3784_v5 }
 0x2c2   :  { %3496 = vmatprep.subr.bf16.mxu1 %v3976_v62 }
 0x2c5   :  { %3497 = vmatpush3.bf16.msra.mxu1 %v3785_v6 }
 0x2c6   :  { %3498 = vmatprep.subr.bf16.mxu1 %v3976_v62 }
 0x2c9   :  { %3499 = vmatpush3.bf16.msra.mxu1 %v3786_v7 }
 0x36c   :  { %v2467_v58 = vpop.f32.mrf.mxu1 }
 0x36d   :  { %v2468_v59 = vadd.f32 %v2467_v58, %v2346_v56 }
 0x36e   :  { %v2469_v60 = vpop.f32.mrf.mxu1 }
 0x36f   :  { %v2470_v61 = vadd.f32 %v2469_v60, %v2350_v57  ;;  %v2474_v63 = vmax.f32 %v2468_v59, 0.0 }
 0x370   :  { %v2471_v0 = vpop.f32.mrf.mxu1 }
 0x371   :  { %v2475_v1 = vmax.f32 %v2470_v61, 0.0  ;;  %v2476_v4 = vpack.c.bf16 %v2474_v63, %v2474_v63 }
 0x372   :  { %v2472_v2 = vpop.f32.mrf.mxu1 }
 0x373   :  { %v2477_v3 = vpack.c.bf16 %v2475_v1, %v2475_v1 }
 0x375   :  { %2645 = vmatprep.mubr.bf16.mxu0 %v2477_v3 }
 0x376   :  { %2646 = vmatmul.mubr.bf16.vlgmr.msra.gmra.mxu0 %v2476_v4 }
 0x377   :  { %3520 = vmatprep.mubr.msk.bf16.mxu0 %vm3977_vm0, %v3976_v62  ;;  %3505 = vmatpush3.bf16.msra.mxu0 %v3787_v8 }
 0x378   :  { %3506 = vmatprep.subr.bf16.mxu0 %v3976_v62 }
 0x37b   :  { %3507 = vmatpush3.bf16.msra.mxu0 %v3788_v9 }
 0x37c   :  { %3508 = vmatprep.subr.bf16.mxu0 %v3976_v62 }
 0x37f   :  { %3509 = vmatpush3.bf16.msra.mxu0 %v3789_v10 }
 0x380   :  { %3510 = vmatprep.subr.bf16.mxu0 %v3976_v62 }
 0x383   :  { %3511 = vmatpush3.bf16.msra.mxu0 %v3790_v11 }
 0x384   :  { %3512 = vmatprep.subr.bf16.mxu0 %v3976_v62 }
 0x387   :  { %3513 = vmatpush3.bf16.msra.mxu0 %v3791_v12 }
 0x388   :  { %3514 = vmatprep.subr.bf16.mxu0 %v3976_v62 }
 0x38b   :  { %3515 = vmatpush3.bf16.msra.mxu0 %v3792_v13 }
 0x38c   :  { %3516 = vmatprep.subr.bf16.mxu0 %v3976_v62 }
 0x38f   :  { %3517 = vmatpush3.bf16.msra.mxu0 %v3793_v23 }
 0x390   :  { %3518 = vmatprep.subr.bf16.mxu0 %v3976_v62 }
 0x393   :  { %3519 = vmatpush3.bf16.msra.mxu0 %v3794_v24 }
 0x436   :  { %v3440_v14 = vpop.f32.mrf.mxu0 }
 0x438   :  { %v3441_v16 = vpop.f32.mrf.mxu0 }
 0x439   :  { %v3442_v17 = vadd.f32 %v3441_v16, %v3440_v14 }
 0x43a   :  { %v3443_v18 = vpop.f32.mrf.mxu0 }
 0x43b   :  { %v2648_v19 = vadd.f32 %v3442_v17, %v3116_v15 }
 0x43c   :  { %v3444_v20 = vpop.f32.mrf.mxu0 }
 0x43d   :  { %v2653_v21 = vmax.f32 %v2648_v19, 0.0 }
 0x43f   :  { %v2654_v22 = vpack.c.bf16 %v2653_v21, %v2653_v21 }
 0x441   :  { %3501 = vmatmul.mubr.bf16.vlgmr.msra.gmra.mxu1 %v2654_v22 }
 0x501   :  { %v2760_v26 = vpop.f32.mrf.mxu1 }
 0x502   :  { %v2761_v27 = vadd.f32 %v3133_v25, %v2760_v26 }
 0x503   :  { %v3502_v28 = vpop.f32.mrf.mxu1 }
 0x504   :  { %v2766_v29 = vmax.f32 %v2761_v27, 0.0 }
 0x505   :  { %v2763_v30 = vpop.f32.mrf.mxu1 }
 0x506   :  { %v2767_v31 = vpack.c.bf16 %v2766_v29, %v2766_v29 }
 0x507   :  { %v3503_v32 = vpop.f32.mrf.mxu1 }
 0x508   :  { %3521 = vmatmul.mubr.bf16.vlgmr.msra.gmra.mxu0 %v2767_v31 }
 0x5c8   :  { %v2873_v62 = vpop.f32.mrf.mxu0 }
 0x5c9   :  { %v2874_v34 = vadd.f32 %v3142_v33, %v2873_v62 }
 0x5ca   :  { %v3522_v35 = vpop.f32.mrf.mxu0 }
 0x5cb   :  { %2879 = vst [vmem:[#allocation14] sm:$0xff] %v2874_v34 }
 0x5cc   :  { %v2876_v36 = vpop.f32.mrf.mxu0 }
 0x5cd   :  { %3946 = shalt.err (!%p3943_p11)
}
 0x5ce   :  { %2889 = dma.vmem_to_hbm [thread:$0]  %s2887_s15, 128, %s4150_s13, [#allocation4]   ;;  %v3523_v37 = vpop.f32.mrf.mxu0 }
 0x5cf   :  { %3963 = dma.done.wait [#allocation4], 128  }
 0x5d0   :  { %3964 = vsyncadd [#allocation4], 4294967168 }
 0x5d1   :  { %2893 = vsyncpa [#allocation3], 1 }
 0x5d2   :  { %2894 = vsyncpa [#allocation6], 1 }
 0x5d3   :  { %2895 = vsyncpa [#allocation9], 1 }
 0x5d4   :  { %2896 = vsyncpa [#allocation12], 1 }
 0x5d5   :  { %2897 = vsyncpa [#allocation4], 1 }

</bundles_post_ra>
